<compile_context>
chip_gen: v5e
topology: v5e:2x2
jax: 0.10.0
libtpu: 0.0.40
codegen_flags: <defaults>
</compile_context>

<pallas_src>
import jax
import jax.numpy as jnp
from jax.experimental import pallas as pl
from jax.experimental.pallas import tpu as pltpu


def _phase_taps(k, padding, stride):
    """Per output phase a in [0, stride): list of (kernel tap i, input row offset d).

    Transposed conv: out[s*q + a] += x[q + d] * W[i] for every i in [0, k) with
    (a + padding - i) % s == 0, where d = (a + padding - i) // s.
    """
    taps = []
    for a in range(stride):
        ta = []
        for i in range(k):
            if (a + padding - i) % stride == 0:
                ta.append((i, (a + padding - i) // stride))
        taps.append(ta)
    return taps


def _make_kernel(cin, cout, kh, kw, H, W, Hp, Wp, off_h, off_w, Hq, Wq,
                 taps_h, taps_w, stride,
                 lin_scale, bias_scale, weight_scale, demodulate, eps):
    kk = kh * kw
    s = stride

    def kernel(wlat_ref, linw_ref, bias_ref, wexp_ref, x_ref, out_ref, xpad_ref):
        bi = pl.program_id(0)

        # ---- style: EqualizedLinear(w) -> + bias*lr_mul -> +1, one row per (ci,i,j) ----
        w_row = wlat_ref[pl.ds(bi, 1), :].astype(jnp.float32)              # (1, wdim)
        lin_w = linw_ref[...].astype(jnp.float32)                          # (cin*kk, wdim)
        style = jnp.sum(lin_w * w_row, axis=1, keepdims=True) * lin_scale
        style = style + bias_ref[...].astype(jnp.float32) * bias_scale + 1.0  # (cin*kk, 1)

        # ---- modulated + demod-folded weights; lanes = (co, qw), rows = (ci, i, j) ----
        wmod = wexp_ref[...].astype(jnp.float32) * style * weight_scale    # (cin*kk, cout*Wq)
        if demodulate:
            # per-co sum over (ci, i, j); each lane of a co segment holds the same value,
            # so folding here is exact and removes any post-loop plane rescale.
            colsum = jnp.sum(wmod * wmod, axis=0, keepdims=True)           # (1, cout*Wq)
            wmod = wmod * jax.lax.rsqrt(colsum + eps)

        # ---- stage x into a zero-padded VMEM plane (small halo for the phase taps) ----
        if (Hp, Wp) != (H, W):
            xpad_ref[...] = jnp.zeros_like(xpad_ref)
        xpad_ref[:, off_h:off_h + H, off_w:off_w + W] = x_ref[0].astype(jnp.float32)

        # ---- polyphase gather conv, cout packed along lanes ----
        accs = {(pa, pb): jnp.zeros((Hq, cout * Wq), jnp.float32)
                for pa in range(s) for pb in range(s)}
        for ci in range(cin):
            for pb in range(s):                               # output column phase
                for (j, dwj) in taps_w[pb]:
                    # lane shift + lane tiling once per (ci, pb, j); reused by all row taps
                    xcol = xpad_ref[ci, :, off_w + dwj:off_w + dwj + Wq]   # (Hp, Wq)
                    xt = jnp.concatenate([xcol] * cout, axis=1)            # (Hp, cout*Wq)
                    for pa in range(s):                       # output row phase
                        for (i, dhi) in taps_h[pa]:
                            r = ci * kk + i * kw + j
                            xs = xt[off_h + dhi:off_h + dhi + Hq, :]       # (Hq, cout*Wq)
                            accs[(pa, pb)] = accs[(pa, pb)] + xs * wmod[r:r + 1, :]

        # ---- lane-dense stores: one contiguous (Hq, s*cout*Wq) slab per row phase ----
        for pa in range(s):
            slab = jnp.concatenate([accs[(pa, pb)] for pb in range(s)], axis=1)
            out_ref[0, pa, :, :] = slab.astype(out_ref.dtype)

    return kernel


def upsample_conv2d(x, w_latent, conv_weight, lin_weight, bias, *,
                    stride, padding, lr_mul=1.0, demodulate=True):
    """Pallas TPU forward of UpSampleConv2d for pack = (x, w_latent)."""
    B, cin, H, W = x.shape
    cin_w, cout, kh, kw = conv_weight.shape
    assert cin_w == cin
    wdim = w_latent.shape[-1]
    assert w_latent.shape == (B, wdim)
    assert lin_weight.shape == (cin, wdim)
    assert bias.shape == (cin,)
    assert stride >= 1 and padding >= 0
    s = stride
    kk = kh * kw

    Hout = (H - 1) * s - 2 * padding + kh
    Wout = (W - 1) * s - 2 * padding + kw
    assert Hout > 0 and Wout > 0

    weight_scale = float(lr_mul / (cin * kh * kw) ** 0.5)
    lin_scale = float(lr_mul / wdim ** 0.5)
    bias_scale = float(lr_mul)
    eps = 1e-8

    # Polyphase tap tables (trace-time Python).
    taps_h = _phase_taps(kh, padding, s)
    taps_w = _phase_taps(kw, padding, s)
    Hq = -(-Hout // s)            # quotient rows per phase (phase 0 has the most)
    Wq = -(-Wout // s)

    # Halo so every per-phase tap slice stays in-bounds (zeros outside x are exact:
    # out-of-range input rows contribute nothing to the transposed conv).
    dh = [d for ta in taps_h for (_, d) in ta] or [0]
    dw = [d for ta in taps_w for (_, d) in ta] or [0]
    lo_h, hi_h = min(0, min(dh)), max(H, max(d + Hq for d in dh))
    lo_w, hi_w = min(0, min(dw)), max(W, max(d + Wq for d in dw))
    off_h, off_w = -lo_h, -lo_w
    Hp, Wp = hi_h - lo_h, hi_w - lo_w

    # Wrapper-side (tiny, one-off) weight layout prep:
    #  * base conv weight: rows = (ci, i, j), lanes = (co, qw) with each value replicated
    #    across its Wq-lane co segment -> zero in-kernel weight lane broadcasts.
    #  * EqualizedLinear weight / bias replicated per tap row so the style lands directly
    #    on the (cin*kk, 1) sublane layout the modulation needs.
    wexp = jnp.repeat(
        jnp.transpose(conv_weight, (0, 2, 3, 1)).reshape(cin * kk, cout), Wq, axis=1)
    lin_rep = jnp.repeat(lin_weight, kk, axis=0)                # (cin*kk, wdim)
    bias_rep = jnp.repeat(bias.reshape(cin, 1), kk, axis=0)     # (cin*kk, 1)

    kernel = _make_kernel(cin, cout, kh, kw, H, W, Hp, Wp, off_h, off_w, Hq, Wq,
                          taps_h, taps_w, s,
                          lin_scale, bias_scale, weight_scale, demodulate, eps)

    y = pl.pallas_call(
        kernel,
        out_shape=jax.ShapeDtypeStruct((B, s, Hq, s * cout * Wq), x.dtype),
        grid=(B,),
        in_specs=[
            pl.BlockSpec((B, wdim), lambda b: (0, 0)),               # style latents
            pl.BlockSpec((cin * kk, wdim), lambda b: (0, 0)),        # EqualizedLinear weight
            pl.BlockSpec((cin * kk, 1), lambda b: (0, 0)),           # channel-wise bias
            pl.BlockSpec((cin * kk, cout * Wq), lambda b: (0, 0)),   # lane-expanded base weight
            pl.BlockSpec((1, cin, H, W), lambda b: (b, 0, 0, 0)),    # compact original x
        ],
        out_specs=pl.BlockSpec((1, s, Hq, s * cout * Wq), lambda b: (b, 0, 0, 0)),
        scratch_shapes=[pltpu.VMEM((cin, Hp, Wp), jnp.float32)],
        compiler_params=pltpu.CompilerParams(
            dimension_semantics=("parallel",),   # 2-TC split on v7x; serial loop elsewhere
        ),
    )(w_latent, lin_rep, bias_rep, wexp, x)

    # Phase interleave (depth-to-space) + crop: pure layout plumbing in the wrapper.
    y = y.reshape(B, s, Hq, s, cout, Wq)              # (b, pa, qh, pb, co, qw)
    y = jnp.transpose(y, (0, 4, 2, 1, 5, 3))          # (b, co, qh, pa, qw, pb)
    y = y.reshape(B, cout, Hq * s, Wq * s)
    return y[:, :, :Hout, :Wout]


def upsample_conv2d_reference(x, w_latent, conv_weight, lin_weight, bias, *,
                              stride, padding, lr_mul=1.0, demodulate=True):
    """Pure-JAX/XLA reference mirroring the PyTorch module (independent of the kernel)."""
    B, cin, H, W = x.shape
    _, cout, kh, kw = conv_weight.shape
    wdim = w_latent.shape[-1]
    weight_scale = lr_mul / (cin * kh * kw) ** 0.5
    lin_scale = lr_mul / wdim ** 0.5
    hi = jax.lax.Precision.HIGHEST

    style = jnp.dot(w_latent, (lin_weight * lin_scale).T, precision=hi)
    style = style + bias[None, :] * lr_mul + 1.0                       # (B, cin)

    outs = []
    for b in range(B):
        wb = conv_weight * style[b][:, None, None, None] * weight_scale
        if demodulate:
            d = jax.lax.rsqrt(jnp.sum(wb * wb, axis=(0, 2, 3)) + 1e-8)
            wb = wb * d[None, :, None, None]
        rhs = jnp.transpose(jnp.flip(wb, (2, 3)), (1, 0, 2, 3))        # OIHW
        outs.append(jax.lax.conv_general_dilated(
            x[b:b + 1], rhs, window_strides=(1, 1),
            padding=((kh - 1 - padding,) * 2, (kw - 1 - padding,) * 2),
            lhs_dilation=(stride, stride), rhs_dilation=(1, 1),
            dimension_numbers=("NCHW", "OIHW", "NCHW"), precision=hi))
    return jnp.concatenate(outs, axis=0)


if __name__ == "__main__":
    key = jax.random.PRNGKey(0)
    k1, k2, k3, k4, k5 = jax.random.split(key, 5)

    B, cin, cout = 2, 4, 4
    H = W = 16
    kh = kw = 3
    stride, padding = 2, 1
    wdim = 32
    lr_mul = 1.0

    x = jax.random.normal(k1, (B, cin, H, W), dtype=jnp.float32)
    w_latent = jax.random.normal(k2, (B, wdim), dtype=jnp.float32)
    conv_weight = 1.0 + jax.random.normal(k3, (cin, cout, kh, kw), dtype=jnp.float32) / lr_mul
    lin_weight = jax.random.normal(k4, (cin, wdim), dtype=jnp.float32) / lr_mul
    bias = 0.1 * jax.random.normal(k5, (cin,), dtype=jnp.float32)

    out = upsample_conv2d(x, w_latent, conv_weight, lin_weight, bias,
                          stride=stride, padding=padding,
                          lr_mul=lr_mul, demodulate=True)
    out = jax.block_until_ready(out)

    ref = upsample_conv2d_reference(x, w_latent, conv_weight, lin_weight, bias,
                                    stride=stride, padding=padding,
                                    lr_mul=lr_mul, demodulate=True)

    hout = (H - 1) * stride - 2 * padding + kh
    wout = (W - 1) * stride - 2 * padding + kw
    assert out.shape == (B, cout, hout, wout), out.shape
    assert out.dtype == x.dtype
    err = float(jnp.max(jnp.abs(out - ref)))
    assert err < 1e-3, f"max abs error {err}"

    print("KERNEL_OK")
</pallas_src>

<mosaic_0001>
module attributes {stable_mosaic.version = 11 : i64} {
  func.func @kernel(%arg0: i32, %arg1: memref<2x32xf32, #tpu.memory_space<vmem>>, %arg2: memref<36x32xf32, #tpu.memory_space<vmem>>, %arg3: memref<36x1xf32, #tpu.memory_space<vmem>>, %arg4: memref<36x64xf32, #tpu.memory_space<vmem>>, %arg5: memref<1x4x16x16xf32, #tpu.memory_space<vmem>>, %arg6: memref<1x2x16x128xf32, #tpu.memory_space<vmem>>, %arg7: memref<4x17x17xf32, #tpu.memory_space<vmem>>) attributes {dimension_semantics = [#tpu.dimension_semantics<parallel>], iteration_bounds = array<i64: 2>, scalar_prefetch = 0 : i64, scratch_operands = 1 : i64, tpu.core_type = #tpu.core_type<tc>, window_params = [{pipeline_mode = #tpu.pipeline_mode<synchronous>, transform_indices = @transform_0, window_bounds = array<i64: 2, 32>}, {pipeline_mode = #tpu.pipeline_mode<synchronous>, transform_indices = @transform_1, window_bounds = array<i64: 36, 32>}, {pipeline_mode = #tpu.pipeline_mode<synchronous>, transform_indices = @transform_2, window_bounds = array<i64: 36, 1>}, {pipeline_mode = #tpu.pipeline_mode<synchronous>, transform_indices = @transform_3, window_bounds = array<i64: 36, 64>}, {transform_indices = @transform_4, window_bounds = array<i64: 1, 4, 16, 16>}, {transform_indices = @transform_5, window_bounds = array<i64: 1, 2, 16, 128>}]} {
    %0 = arith.index_cast %arg0 : i32 to index
    %c0 = arith.constant 0 : index
    %1 = vector.load %arg1[%0, %c0] : memref<2x32xf32, #tpu.memory_space<vmem>>, vector<1x32xf32>
    %c0_0 = arith.constant 0 : index
    %c0_1 = arith.constant 0 : index
    %2 = vector.load %arg2[%c0_0, %c0_1] : memref<36x32xf32, #tpu.memory_space<vmem>>, vector<36x32xf32>
    %3 = vector.broadcast %1 : vector<1x32xf32> to vector<36x32xf32>
    %4 = arith.mulf %2, %3 : vector<36x32xf32>
    %cst = arith.constant dense<0.000000e+00> : vector<36xf32>
    %5 = vector.multi_reduction <add>, %4, %cst [1] : vector<36x32xf32> to vector<36xf32>
    %6 = vector.shape_cast %5 : vector<36xf32> to vector<36x1xf32>
    %cst_2 = arith.constant 0.176776692 : f32
    %7 = vector.broadcast %cst_2 : f32 to vector<36x1xf32>
    %8 = arith.mulf %6, %7 : vector<36x1xf32>
    %c0_3 = arith.constant 0 : index
    %c0_4 = arith.constant 0 : index
    %9 = vector.load %arg3[%c0_3, %c0_4] : memref<36x1xf32, #tpu.memory_space<vmem>>, vector<36x1xf32>
    %cst_5 = arith.constant 1.000000e+00 : f32
    %10 = vector.broadcast %cst_5 : f32 to vector<36x1xf32>
    %11 = arith.mulf %9, %10 : vector<36x1xf32>
    %12 = arith.addf %8, %11 : vector<36x1xf32>
    %cst_6 = arith.constant 1.000000e+00 : f32
    %13 = vector.broadcast %cst_6 : f32 to vector<36x1xf32>
    %14 = arith.addf %12, %13 : vector<36x1xf32>
    %c0_7 = arith.constant 0 : index
    %c0_8 = arith.constant 0 : index
    %15 = vector.load %arg4[%c0_7, %c0_8] : memref<36x64xf32, #tpu.memory_space<vmem>>, vector<36x64xf32>
    %16 = vector.broadcast %14 : vector<36x1xf32> to vector<36x64xf32>
    %17 = arith.mulf %15, %16 : vector<36x64xf32>
    %cst_9 = arith.constant 0.166666672 : f32
    %18 = vector.broadcast %cst_9 : f32 to vector<36x64xf32>
    %19 = arith.mulf %17, %18 : vector<36x64xf32>
    %20 = arith.mulf %19, %19 : vector<36x64xf32>
    %cst_10 = arith.constant dense<0.000000e+00> : vector<64xf32>
    %21 = vector.multi_reduction <add>, %20, %cst_10 [0] : vector<36x64xf32> to vector<64xf32>
    %22 = vector.shape_cast %21 : vector<64xf32> to vector<1x64xf32>
    %cst_11 = arith.constant 9.99999993E-9 : f32
    %23 = vector.broadcast %cst_11 : f32 to vector<1x64xf32>
    %24 = arith.addf %22, %23 : vector<1x64xf32>
    %25 = math.rsqrt %24 : vector<1x64xf32>
    %26 = vector.broadcast %25 : vector<1x64xf32> to vector<36x64xf32>
    %27 = arith.mulf %19, %26 : vector<36x64xf32>
    %cst_12 = arith.constant 0.000000e+00 : f32
    %28 = vector.broadcast %cst_12 : f32 to vector<4x17x17xf32>
    %c0_13 = arith.constant 0 : index
    %c0_14 = arith.constant 0 : index
    %c0_15 = arith.constant 0 : index
    %29 = vector.load %arg7[%c0_13, %c0_14, %c0_15] : memref<4x17x17xf32, #tpu.memory_space<vmem>>, vector<4x17x17xf32>
    tpu.vector_store %arg7[%c0_13, %c0_14, %c0_15], %28 {strides = array<i32>} : memref<4x17x17xf32, #tpu.memory_space<vmem>>, vector<4x17x17xf32>,
    %c0_16 = arith.constant 0 : index
    %c0_17 = arith.constant 0 : index
    %c0_18 = arith.constant 0 : index
    %c0_19 = arith.constant 0 : index
    %30 = vector.load %arg5[%c0_16, %c0_17, %c0_18, %c0_19] : memref<1x4x16x16xf32, #tpu.memory_space<vmem>>, vector<1x4x16x16xf32>
    %31 = vector.shape_cast %30 : vector<1x4x16x16xf32> to vector<4x16x16xf32>
    %c0_20 = arith.constant 0 : index
    %c0_21 = arith.constant 0 : index
    %c0_22 = arith.constant 0 : index
    %32 = vector.load %arg7[%c0_20, %c0_21, %c0_22] : memref<4x17x17xf32, #tpu.memory_space<vmem>>, vector<4x16x16xf32>
    tpu.vector_store %arg7[%c0_20, %c0_21, %c0_22], %31 {strides = array<i32>} : memref<4x17x17xf32, #tpu.memory_space<vmem>>, vector<4x16x16xf32>,
    %cst_23 = arith.constant 0.000000e+00 : f32
    %33 = vector.broadcast %cst_23 : f32 to vector<16x64xf32>
    %cst_24 = arith.constant 0.000000e+00 : f32
    %34 = vector.broadcast %cst_24 : f32 to vector<16x64xf32>
    %cst_25 = arith.constant 0.000000e+00 : f32
    %35 = vector.broadcast %cst_25 : f32 to vector<16x64xf32>
    %cst_26 = arith.constant 0.000000e+00 : f32
    %36 = vector.broadcast %cst_26 : f32 to vector<16x64xf32>
    %c0_27 = arith.constant 0 : index
    %c0_28 = arith.constant 0 : index
    %c0_29 = arith.constant 0 : index
    %37 = vector.load %arg7[%c0_27, %c0_28, %c0_29] : memref<4x17x17xf32, #tpu.memory_space<vmem>>, vector<1x17x16xf32>
    %38 = vector.shape_cast %37 : vector<1x17x16xf32> to vector<17x16xf32>
    %39 = tpu.concatenate %38, %38, %38, %38 in 1 : vector<17x16xf32>, vector<17x16xf32>, vector<17x16xf32>, vector<17x16xf32> -> vector<17x64xf32>
    %40 = vector.extract_strided_slice %39 {offsets = [0, 0], sizes = [16, 64], strides = [1, 1]} : vector<17x64xf32> to vector<16x64xf32>
    %41 = vector.extract_strided_slice %27 {offsets = [4, 0], sizes = [1, 64], strides = [1, 1]} : vector<36x64xf32> to vector<1x64xf32>
    %42 = vector.broadcast %41 : vector<1x64xf32> to vector<16x64xf32>
    %43 = arith.mulf %40, %42 : vector<16x64xf32>
    %44 = arith.addf %33, %43 : vector<16x64xf32>
    %45 = vector.extract_strided_slice %39 {offsets = [1, 0], sizes = [16, 64], strides = [1, 1]} : vector<17x64xf32> to vector<16x64xf32>
    %46 = vector.extract_strided_slice %27 {offsets = [1, 0], sizes = [1, 64], strides = [1, 1]} : vector<36x64xf32> to vector<1x64xf32>
    %47 = vector.broadcast %46 : vector<1x64xf32> to vector<16x64xf32>
    %48 = arith.mulf %45, %47 : vector<16x64xf32>
    %49 = arith.addf %35, %48 : vector<16x64xf32>
    %50 = vector.extract_strided_slice %39 {offsets = [0, 0], sizes = [16, 64], strides = [1, 1]} : vector<17x64xf32> to vector<16x64xf32>
    %51 = vector.extract_strided_slice %27 {offsets = [7, 0], sizes = [1, 64], strides = [1, 1]} : vector<36x64xf32> to vector<1x64xf32>
    %52 = vector.broadcast %51 : vector<1x64xf32> to vector<16x64xf32>
    %53 = arith.mulf %50, %52 : vector<16x64xf32>
    %54 = arith.addf %49, %53 : vector<16x64xf32>
    %c0_30 = arith.constant 0 : index
    %c0_31 = arith.constant 0 : index
    %c1 = arith.constant 1 : index
    %55 = vector.load %arg7[%c0_30, %c0_31, %c1] : memref<4x17x17xf32, #tpu.memory_space<vmem>>, vector<1x17x16xf32>
    %56 = vector.shape_cast %55 : vector<1x17x16xf32> to vector<17x16xf32>
    %57 = tpu.concatenate %56, %56, %56, %56 in 1 : vector<17x16xf32>, vector<17x16xf32>, vector<17x16xf32>, vector<17x16xf32> -> vector<17x64xf32>
    %58 = vector.extract_strided_slice %57 {offsets = [0, 0], sizes = [16, 64], strides = [1, 1]} : vector<17x64xf32> to vector<16x64xf32>
    %59 = vector.extract_strided_slice %27 {offsets = [3, 0], sizes = [1, 64], strides = [1, 1]} : vector<36x64xf32> to vector<1x64xf32>
    %60 = vector.broadcast %59 : vector<1x64xf32> to vector<16x64xf32>
    %61 = arith.mulf %58, %60 : vector<16x64xf32>
    %62 = arith.addf %34, %61 : vector<16x64xf32>
    %63 = vector.extract_strided_slice %57 {offsets = [1, 0], sizes = [16, 64], strides = [1, 1]} : vector<17x64xf32> to vector<16x64xf32>
    %64 = vector.extract_strided_slice %27 {offsets = [0, 0], sizes = [1, 64], strides = [1, 1]} : vector<36x64xf32> to vector<1x64xf32>
    %65 = vector.broadcast %64 : vector<1x64xf32> to vector<16x64xf32>
    %66 = arith.mulf %63, %65 : vector<16x64xf32>
    %67 = arith.addf %36, %66 : vector<16x64xf32>
    %68 = vector.extract_strided_slice %57 {offsets = [0, 0], sizes = [16, 64], strides = [1, 1]} : vector<17x64xf32> to vector<16x64xf32>
    %69 = vector.extract_strided_slice %27 {offsets = [6, 0], sizes = [1, 64], strides = [1, 1]} : vector<36x64xf32> to vector<1x64xf32>
    %70 = vector.broadcast %69 : vector<1x64xf32> to vector<16x64xf32>
    %71 = arith.mulf %68, %70 : vector<16x64xf32>
    %72 = arith.addf %67, %71 : vector<16x64xf32>
    %c0_32 = arith.constant 0 : index
    %c0_33 = arith.constant 0 : index
    %c0_34 = arith.constant 0 : index
    %73 = vector.load %arg7[%c0_32, %c0_33, %c0_34] : memref<4x17x17xf32, #tpu.memory_space<vmem>>, vector<1x17x16xf32>
    %74 = vector.shape_cast %73 : vector<1x17x16xf32> to vector<17x16xf32>
    %75 = tpu.concatenate %74, %74, %74, %74 in 1 : vector<17x16xf32>, vector<17x16xf32>, vector<17x16xf32>, vector<17x16xf32> -> vector<17x64xf32>
    %76 = vector.extract_strided_slice %75 {offsets = [0, 0], sizes = [16, 64], strides = [1, 1]} : vector<17x64xf32> to vector<16x64xf32>
    %77 = vector.extract_strided_slice %27 {offsets = [5, 0], sizes = [1, 64], strides = [1, 1]} : vector<36x64xf32> to vector<1x64xf32>
    %78 = vector.broadcast %77 : vector<1x64xf32> to vector<16x64xf32>
    %79 = arith.mulf %76, %78 : vector<16x64xf32>
    %80 = arith.addf %62, %79 : vector<16x64xf32>
    %81 = vector.extract_strided_slice %75 {offsets = [1, 0], sizes = [16, 64], strides = [1, 1]} : vector<17x64xf32> to vector<16x64xf32>
    %82 = vector.extract_strided_slice %27 {offsets = [2, 0], sizes = [1, 64], strides = [1, 1]} : vector<36x64xf32> to vector<1x64xf32>
    %83 = vector.broadcast %82 : vector<1x64xf32> to vector<16x64xf32>
    %84 = arith.mulf %81, %83 : vector<16x64xf32>
    %85 = arith.addf %72, %84 : vector<16x64xf32>
    %86 = vector.extract_strided_slice %75 {offsets = [0, 0], sizes = [16, 64], strides = [1, 1]} : vector<17x64xf32> to vector<16x64xf32>
    %87 = vector.extract_strided_slice %27 {offsets = [8, 0], sizes = [1, 64], strides = [1, 1]} : vector<36x64xf32> to vector<1x64xf32>
    %88 = vector.broadcast %87 : vector<1x64xf32> to vector<16x64xf32>
    %89 = arith.mulf %86, %88 : vector<16x64xf32>
    %90 = arith.addf %85, %89 : vector<16x64xf32>
    %c1_35 = arith.constant 1 : index
    %c0_36 = arith.constant 0 : index
    %c0_37 = arith.constant 0 : index
    %91 = vector.load %arg7[%c1_35, %c0_36, %c0_37] : memref<4x17x17xf32, #tpu.memory_space<vmem>>, vector<1x17x16xf32>
    %92 = vector.shape_cast %91 : vector<1x17x16xf32> to vector<17x16xf32>
    %93 = tpu.concatenate %92, %92, %92, %92 in 1 : vector<17x16xf32>, vector<17x16xf32>, vector<17x16xf32>, vector<17x16xf32> -> vector<17x64xf32>
    %94 = vector.extract_strided_slice %93 {offsets = [0, 0], sizes = [16, 64], strides = [1, 1]} : vector<17x64xf32> to vector<16x64xf32>
    %95 = vector.extract_strided_slice %27 {offsets = [13, 0], sizes = [1, 64], strides = [1, 1]} : vector<36x64xf32> to vector<1x64xf32>
    %96 = vector.broadcast %95 : vector<1x64xf32> to vector<16x64xf32>
    %97 = arith.mulf %94, %96 : vector<16x64xf32>
    %98 = arith.addf %44, %97 : vector<16x64xf32>
    %99 = vector.extract_strided_slice %93 {offsets = [1, 0], sizes = [16, 64], strides = [1, 1]} : vector<17x64xf32> to vector<16x64xf32>
    %100 = vector.extract_strided_slice %27 {offsets = [10, 0], sizes = [1, 64], strides = [1, 1]} : vector<36x64xf32> to vector<1x64xf32>
    %101 = vector.broadcast %100 : vector<1x64xf32> to vector<16x64xf32>
    %102 = arith.mulf %99, %101 : vector<16x64xf32>
    %103 = arith.addf %54, %102 : vector<16x64xf32>
    %104 = vector.extract_strided_slice %93 {offsets = [0, 0], sizes = [16, 64], strides = [1, 1]} : vector<17x64xf32> to vector<16x64xf32>
    %105 = vector.extract_strided_slice %27 {offsets = [16, 0], sizes = [1, 64], strides = [1, 1]} : vector<36x64xf32> to vector<1x64xf32>
    %106 = vector.broadcast %105 : vector<1x64xf32> to vector<16x64xf32>
    %107 = arith.mulf %104, %106 : vector<16x64xf32>
    %108 = arith.addf %103, %107 : vector<16x64xf32>
    %c1_38 = arith.constant 1 : index
    %c0_39 = arith.constant 0 : index
    %c1_40 = arith.constant 1 : index
    %109 = vector.load %arg7[%c1_38, %c0_39, %c1_40] : memref<4x17x17xf32, #tpu.memory_space<vmem>>, vector<1x17x16xf32>
    %110 = vector.shape_cast %109 : vector<1x17x16xf32> to vector<17x16xf32>
    %111 = tpu.concatenate %110, %110, %110, %110 in 1 : vector<17x16xf32>, vector<17x16xf32>, vector<17x16xf32>, vector<17x16xf32> -> vector<17x64xf32>
    %112 = vector.extract_strided_slice %111 {offsets = [0, 0], sizes = [16, 64], strides = [1, 1]} : vector<17x64xf32> to vector<16x64xf32>
    %113 = vector.extract_strided_slice %27 {offsets = [12, 0], sizes = [1, 64], strides = [1, 1]} : vector<36x64xf32> to vector<1x64xf32>
    %114 = vector.broadcast %113 : vector<1x64xf32> to vector<16x64xf32>
    %115 = arith.mulf %112, %114 : vector<16x64xf32>
    %116 = arith.addf %80, %115 : vector<16x64xf32>
    %117 = vector.extract_strided_slice %111 {offsets = [1, 0], sizes = [16, 64], strides = [1, 1]} : vector<17x64xf32> to vector<16x64xf32>
    %118 = vector.extract_strided_slice %27 {offsets = [9, 0], sizes = [1, 64], strides = [1, 1]} : vector<36x64xf32> to vector<1x64xf32>
    %119 = vector.broadcast %118 : vector<1x64xf32> to vector<16x64xf32>
    %120 = arith.mulf %117, %119 : vector<16x64xf32>
    %121 = arith.addf %90, %120 : vector<16x64xf32>
    %122 = vector.extract_strided_slice %111 {offsets = [0, 0], sizes = [16, 64], strides = [1, 1]} : vector<17x64xf32> to vector<16x64xf32>
    %123 = vector.extract_strided_slice %27 {offsets = [15, 0], sizes = [1, 64], strides = [1, 1]} : vector<36x64xf32> to vector<1x64xf32>
    %124 = vector.broadcast %123 : vector<1x64xf32> to vector<16x64xf32>
    %125 = arith.mulf %122, %124 : vector<16x64xf32>
    %126 = arith.addf %121, %125 : vector<16x64xf32>
    %c1_41 = arith.constant 1 : index
    %c0_42 = arith.constant 0 : index
    %c0_43 = arith.constant 0 : index
    %127 = vector.load %arg7[%c1_41, %c0_42, %c0_43] : memref<4x17x17xf32, #tpu.memory_space<vmem>>, vector<1x17x16xf32>
    %128 = vector.shape_cast %127 : vector<1x17x16xf32> to vector<17x16xf32>
    %129 = tpu.concatenate %128, %128, %128, %128 in 1 : vector<17x16xf32>, vector<17x16xf32>, vector<17x16xf32>, vector<17x16xf32> -> vector<17x64xf32>
    %130 = vector.extract_strided_slice %129 {offsets = [0, 0], sizes = [16, 64], strides = [1, 1]} : vector<17x64xf32> to vector<16x64xf32>
    %131 = vector.extract_strided_slice %27 {offsets = [14, 0], sizes = [1, 64], strides = [1, 1]} : vector<36x64xf32> to vector<1x64xf32>
    %132 = vector.broadcast %131 : vector<1x64xf32> to vector<16x64xf32>
    %133 = arith.mulf %130, %132 : vector<16x64xf32>
    %134 = arith.addf %116, %133 : vector<16x64xf32>
    %135 = vector.extract_strided_slice %129 {offsets = [1, 0], sizes = [16, 64], strides = [1, 1]} : vector<17x64xf32> to vector<16x64xf32>
    %136 = vector.extract_strided_slice %27 {offsets = [11, 0], sizes = [1, 64], strides = [1, 1]} : vector<36x64xf32> to vector<1x64xf32>
    %137 = vector.broadcast %136 : vector<1x64xf32> to vector<16x64xf32>
    %138 = arith.mulf %135, %137 : vector<16x64xf32>
    %139 = arith.addf %126, %138 : vector<16x64xf32>
    %140 = vector.extract_strided_slice %129 {offsets = [0, 0], sizes = [16, 64], strides = [1, 1]} : vector<17x64xf32> to vector<16x64xf32>
    %141 = vector.extract_strided_slice %27 {offsets = [17, 0], sizes = [1, 64], strides = [1, 1]} : vector<36x64xf32> to vector<1x64xf32>
    %142 = vector.broadcast %141 : vector<1x64xf32> to vector<16x64xf32>
    %143 = arith.mulf %140, %142 : vector<16x64xf32>
    %144 = arith.addf %139, %143 : vector<16x64xf32>
    %c2 = arith.constant 2 : index
    %c0_44 = arith.constant 0 : index
    %c0_45 = arith.constant 0 : index
    %145 = vector.load %arg7[%c2, %c0_44, %c0_45] : memref<4x17x17xf32, #tpu.memory_space<vmem>>, vector<1x17x16xf32>
    %146 = vector.shape_cast %145 : vector<1x17x16xf32> to vector<17x16xf32>
    %147 = tpu.concatenate %146, %146, %146, %146 in 1 : vector<17x16xf32>, vector<17x16xf32>, vector<17x16xf32>, vector<17x16xf32> -> vector<17x64xf32>
    %148 = vector.extract_strided_slice %147 {offsets = [0, 0], sizes = [16, 64], strides = [1, 1]} : vector<17x64xf32> to vector<16x64xf32>
    %149 = vector.extract_strided_slice %27 {offsets = [22, 0], sizes = [1, 64], strides = [1, 1]} : vector<36x64xf32> to vector<1x64xf32>
    %150 = vector.broadcast %149 : vector<1x64xf32> to vector<16x64xf32>
    %151 = arith.mulf %148, %150 : vector<16x64xf32>
    %152 = arith.addf %98, %151 : vector<16x64xf32>
    %153 = vector.extract_strided_slice %147 {offsets = [1, 0], sizes = [16, 64], strides = [1, 1]} : vector<17x64xf32> to vector<16x64xf32>
    %154 = vector.extract_strided_slice %27 {offsets = [19, 0], sizes = [1, 64], strides = [1, 1]} : vector<36x64xf32> to vector<1x64xf32>
    %155 = vector.broadcast %154 : vector<1x64xf32> to vector<16x64xf32>
    %156 = arith.mulf %153, %155 : vector<16x64xf32>
    %157 = arith.addf %108, %156 : vector<16x64xf32>
    %158 = vector.extract_strided_slice %147 {offsets = [0, 0], sizes = [16, 64], strides = [1, 1]} : vector<17x64xf32> to vector<16x64xf32>
    %159 = vector.extract_strided_slice %27 {offsets = [25, 0], sizes = [1, 64], strides = [1, 1]} : vector<36x64xf32> to vector<1x64xf32>
    %160 = vector.broadcast %159 : vector<1x64xf32> to vector<16x64xf32>
    %161 = arith.mulf %158, %160 : vector<16x64xf32>
    %162 = arith.addf %157, %161 : vector<16x64xf32>
    %c2_46 = arith.constant 2 : index
    %c0_47 = arith.constant 0 : index
    %c1_48 = arith.constant 1 : index
    %163 = vector.load %arg7[%c2_46, %c0_47, %c1_48] : memref<4x17x17xf32, #tpu.memory_space<vmem>>, vector<1x17x16xf32>
    %164 = vector.shape_cast %163 : vector<1x17x16xf32> to vector<17x16xf32>
    %165 = tpu.concatenate %164, %164, %164, %164 in 1 : vector<17x16xf32>, vector<17x16xf32>, vector<17x16xf32>, vector<17x16xf32> -> vector<17x64xf32>
    %166 = vector.extract_strided_slice %165 {offsets = [0, 0], sizes = [16, 64], strides = [1, 1]} : vector<17x64xf32> to vector<16x64xf32>
    %167 = vector.extract_strided_slice %27 {offsets = [21, 0], sizes = [1, 64], strides = [1, 1]} : vector<36x64xf32> to vector<1x64xf32>
    %168 = vector.broadcast %167 : vector<1x64xf32> to vector<16x64xf32>
    %169 = arith.mulf %166, %168 : vector<16x64xf32>
    %170 = arith.addf %134, %169 : vector<16x64xf32>
    %171 = vector.extract_strided_slice %165 {offsets = [1, 0], sizes = [16, 64], strides = [1, 1]} : vector<17x64xf32> to vector<16x64xf32>
    %172 = vector.extract_strided_slice %27 {offsets = [18, 0], sizes = [1, 64], strides = [1, 1]} : vector<36x64xf32> to vector<1x64xf32>
    %173 = vector.broadcast %172 : vector<1x64xf32> to vector<16x64xf32>
    %174 = arith.mulf %171, %173 : vector<16x64xf32>
    %175 = arith.addf %144, %174 : vector<16x64xf32>
    %176 = vector.extract_strided_slice %165 {offsets = [0, 0], sizes = [16, 64], strides = [1, 1]} : vector<17x64xf32> to vector<16x64xf32>
    %177 = vector.extract_strided_slice %27 {offsets = [24, 0], sizes = [1, 64], strides = [1, 1]} : vector<36x64xf32> to vector<1x64xf32>
    %178 = vector.broadcast %177 : vector<1x64xf32> to vector<16x64xf32>
    %179 = arith.mulf %176, %178 : vector<16x64xf32>
    %180 = arith.addf %175, %179 : vector<16x64xf32>
    %c2_49 = arith.constant 2 : index
    %c0_50 = arith.constant 0 : index
    %c0_51 = arith.constant 0 : index
    %181 = vector.load %arg7[%c2_49, %c0_50, %c0_51] : memref<4x17x17xf32, #tpu.memory_space<vmem>>, vector<1x17x16xf32>
    %182 = vector.shape_cast %181 : vector<1x17x16xf32> to vector<17x16xf32>
    %183 = tpu.concatenate %182, %182, %182, %182 in 1 : vector<17x16xf32>, vector<17x16xf32>, vector<17x16xf32>, vector<17x16xf32> -> vector<17x64xf32>
    %184 = vector.extract_strided_slice %183 {offsets = [0, 0], sizes = [16, 64], strides = [1, 1]} : vector<17x64xf32> to vector<16x64xf32>
    %185 = vector.extract_strided_slice %27 {offsets = [23, 0], sizes = [1, 64], strides = [1, 1]} : vector<36x64xf32> to vector<1x64xf32>
    %186 = vector.broadcast %185 : vector<1x64xf32> to vector<16x64xf32>
    %187 = arith.mulf %184, %186 : vector<16x64xf32>
    %188 = arith.addf %170, %187 : vector<16x64xf32>
    %189 = vector.extract_strided_slice %183 {offsets = [1, 0], sizes = [16, 64], strides = [1, 1]} : vector<17x64xf32> to vector<16x64xf32>
    %190 = vector.extract_strided_slice %27 {offsets = [20, 0], sizes = [1, 64], strides = [1, 1]} : vector<36x64xf32> to vector<1x64xf32>
    %191 = vector.broadcast %190 : vector<1x64xf32> to vector<16x64xf32>
    %192 = arith.mulf %189, %191 : vector<16x64xf32>
    %193 = arith.addf %180, %192 : vector<16x64xf32>
    %194 = vector.extract_strided_slice %183 {offsets = [0, 0], sizes = [16, 64], strides = [1, 1]} : vector<17x64xf32> to vector<16x64xf32>
    %195 = vector.extract_strided_slice %27 {offsets = [26, 0], sizes = [1, 64], strides = [1, 1]} : vector<36x64xf32> to vector<1x64xf32>
    %196 = vector.broadcast %195 : vector<1x64xf32> to vector<16x64xf32>
    %197 = arith.mulf %194, %196 : vector<16x64xf32>
    %198 = arith.addf %193, %197 : vector<16x64xf32>
    %c3 = arith.constant 3 : index
    %c0_52 = arith.constant 0 : index
    %c0_53 = arith.constant 0 : index
    %199 = vector.load %arg7[%c3, %c0_52, %c0_53] : memref<4x17x17xf32, #tpu.memory_space<vmem>>, vector<1x17x16xf32>
    %200 = vector.shape_cast %199 : vector<1x17x16xf32> to vector<17x16xf32>
    %201 = tpu.concatenate %200, %200, %200, %200 in 1 : vector<17x16xf32>, vector<17x16xf32>, vector<17x16xf32>, vector<17x16xf32> -> vector<17x64xf32>
    %202 = vector.extract_strided_slice %201 {offsets = [0, 0], sizes = [16, 64], strides = [1, 1]} : vector<17x64xf32> to vector<16x64xf32>
    %203 = vector.extract_strided_slice %27 {offsets = [31, 0], sizes = [1, 64], strides = [1, 1]} : vector<36x64xf32> to vector<1x64xf32>
    %204 = vector.broadcast %203 : vector<1x64xf32> to vector<16x64xf32>
    %205 = arith.mulf %202, %204 : vector<16x64xf32>
    %206 = arith.addf %152, %205 : vector<16x64xf32>
    %207 = vector.extract_strided_slice %201 {offsets = [1, 0], sizes = [16, 64], strides = [1, 1]} : vector<17x64xf32> to vector<16x64xf32>
    %208 = vector.extract_strided_slice %27 {offsets = [28, 0], sizes = [1, 64], strides = [1, 1]} : vector<36x64xf32> to vector<1x64xf32>
    %209 = vector.broadcast %208 : vector<1x64xf32> to vector<16x64xf32>
    %210 = arith.mulf %207, %209 : vector<16x64xf32>
    %211 = arith.addf %162, %210 : vector<16x64xf32>
    %212 = vector.extract_strided_slice %201 {offsets = [0, 0], sizes = [16, 64], strides = [1, 1]} : vector<17x64xf32> to vector<16x64xf32>
    %213 = vector.extract_strided_slice %27 {offsets = [34, 0], sizes = [1, 64], strides = [1, 1]} : vector<36x64xf32> to vector<1x64xf32>
    %214 = vector.broadcast %213 : vector<1x64xf32> to vector<16x64xf32>
    %215 = arith.mulf %212, %214 : vector<16x64xf32>
    %216 = arith.addf %211, %215 : vector<16x64xf32>
    %c3_54 = arith.constant 3 : index
    %c0_55 = arith.constant 0 : index
    %c1_56 = arith.constant 1 : index
    %217 = vector.load %arg7[%c3_54, %c0_55, %c1_56] : memref<4x17x17xf32, #tpu.memory_space<vmem>>, vector<1x17x16xf32>
    %218 = vector.shape_cast %217 : vector<1x17x16xf32> to vector<17x16xf32>
    %219 = tpu.concatenate %218, %218, %218, %218 in 1 : vector<17x16xf32>, vector<17x16xf32>, vector<17x16xf32>, vector<17x16xf32> -> vector<17x64xf32>
    %220 = vector.extract_strided_slice %219 {offsets = [0, 0], sizes = [16, 64], strides = [1, 1]} : vector<17x64xf32> to vector<16x64xf32>
    %221 = vector.extract_strided_slice %27 {offsets = [30, 0], sizes = [1, 64], strides = [1, 1]} : vector<36x64xf32> to vector<1x64xf32>
    %222 = vector.broadcast %221 : vector<1x64xf32> to vector<16x64xf32>
    %223 = arith.mulf %220, %222 : vector<16x64xf32>
    %224 = arith.addf %188, %223 : vector<16x64xf32>
    %225 = vector.extract_strided_slice %219 {offsets = [1, 0], sizes = [16, 64], strides = [1, 1]} : vector<17x64xf32> to vector<16x64xf32>
    %226 = vector.extract_strided_slice %27 {offsets = [27, 0], sizes = [1, 64], strides = [1, 1]} : vector<36x64xf32> to vector<1x64xf32>
    %227 = vector.broadcast %226 : vector<1x64xf32> to vector<16x64xf32>
    %228 = arith.mulf %225, %227 : vector<16x64xf32>
    %229 = arith.addf %198, %228 : vector<16x64xf32>
    %230 = vector.extract_strided_slice %219 {offsets = [0, 0], sizes = [16, 64], strides = [1, 1]} : vector<17x64xf32> to vector<16x64xf32>
    %231 = vector.extract_strided_slice %27 {offsets = [33, 0], sizes = [1, 64], strides = [1, 1]} : vector<36x64xf32> to vector<1x64xf32>
    %232 = vector.broadcast %231 : vector<1x64xf32> to vector<16x64xf32>
    %233 = arith.mulf %230, %232 : vector<16x64xf32>
    %234 = arith.addf %229, %233 : vector<16x64xf32>
    %c3_57 = arith.constant 3 : index
    %c0_58 = arith.constant 0 : index
    %c0_59 = arith.constant 0 : index
    %235 = vector.load %arg7[%c3_57, %c0_58, %c0_59] : memref<4x17x17xf32, #tpu.memory_space<vmem>>, vector<1x17x16xf32>
    %236 = vector.shape_cast %235 : vector<1x17x16xf32> to vector<17x16xf32>
    %237 = tpu.concatenate %236, %236, %236, %236 in 1 : vector<17x16xf32>, vector<17x16xf32>, vector<17x16xf32>, vector<17x16xf32> -> vector<17x64xf32>
    %238 = vector.extract_strided_slice %237 {offsets = [0, 0], sizes = [16, 64], strides = [1, 1]} : vector<17x64xf32> to vector<16x64xf32>
    %239 = vector.extract_strided_slice %27 {offsets = [32, 0], sizes = [1, 64], strides = [1, 1]} : vector<36x64xf32> to vector<1x64xf32>
    %240 = vector.broadcast %239 : vector<1x64xf32> to vector<16x64xf32>
    %241 = arith.mulf %238, %240 : vector<16x64xf32>
    %242 = arith.addf %224, %241 : vector<16x64xf32>
    %243 = vector.extract_strided_slice %237 {offsets = [1, 0], sizes = [16, 64], strides = [1, 1]} : vector<17x64xf32> to vector<16x64xf32>
    %244 = vector.extract_strided_slice %27 {offsets = [29, 0], sizes = [1, 64], strides = [1, 1]} : vector<36x64xf32> to vector<1x64xf32>
    %245 = vector.broadcast %244 : vector<1x64xf32> to vector<16x64xf32>
    %246 = arith.mulf %243, %245 : vector<16x64xf32>
    %247 = arith.addf %234, %246 : vector<16x64xf32>
    %248 = vector.extract_strided_slice %237 {offsets = [0, 0], sizes = [16, 64], strides = [1, 1]} : vector<17x64xf32> to vector<16x64xf32>
    %249 = vector.extract_strided_slice %27 {offsets = [35, 0], sizes = [1, 64], strides = [1, 1]} : vector<36x64xf32> to vector<1x64xf32>
    %250 = vector.broadcast %249 : vector<1x64xf32> to vector<16x64xf32>
    %251 = arith.mulf %248, %250 : vector<16x64xf32>
    %252 = arith.addf %247, %251 : vector<16x64xf32>
    %253 = tpu.concatenate %206, %242 in 1 : vector<16x64xf32>, vector<16x64xf32> -> vector<16x128xf32>
    %c0_60 = arith.constant 0 : index
    %c0_61 = arith.constant 0 : index
    %c0_62 = arith.constant 0 : index
    %c0_63 = arith.constant 0 : index
    %254 = vector.load %arg6[%c0_60, %c0_61, %c0_62, %c0_63] : memref<1x2x16x128xf32, #tpu.memory_space<vmem>>, vector<1x1x16x128xf32>
    %255 = vector.shape_cast %254 : vector<1x1x16x128xf32> to vector<16x128xf32>
    %256 = vector.shape_cast %253 : vector<16x128xf32> to vector<1x1x16x128xf32>
    tpu.vector_store %arg6[%c0_60, %c0_61, %c0_62, %c0_63], %256 {strides = array<i32>} : memref<1x2x16x128xf32, #tpu.memory_space<vmem>>, vector<1x1x16x128xf32>,
    %257 = tpu.concatenate %216, %252 in 1 : vector<16x64xf32>, vector<16x64xf32> -> vector<16x128xf32>
    %c0_64 = arith.constant 0 : index
    %c1_65 = arith.constant 1 : index
    %c0_66 = arith.constant 0 : index
    %c0_67 = arith.constant 0 : index
    %258 = vector.load %arg6[%c0_64, %c1_65, %c0_66, %c0_67] : memref<1x2x16x128xf32, #tpu.memory_space<vmem>>, vector<1x1x16x128xf32>
    %259 = vector.shape_cast %258 : vector<1x1x16x128xf32> to vector<16x128xf32>
    %260 = vector.shape_cast %257 : vector<16x128xf32> to vector<1x1x16x128xf32>
    tpu.vector_store %arg6[%c0_64, %c1_65, %c0_66, %c0_67], %260 {strides = array<i32>} : memref<1x2x16x128xf32, #tpu.memory_space<vmem>>, vector<1x1x16x128xf32>,
    return
  }
  func.func @transform_0(%arg0: i32) -> (i32, i32) {
    %c0_i32 = arith.constant 0 : i32
    %c0_i32_0 = arith.constant 0 : i32
    %c0_i32_1 = arith.constant 0 : i32
    return %c0_i32, %c0_i32_0 : i32, i32
  }
  func.func @transform_1(%arg0: i32) -> (i32, i32) {
    %c0_i32 = arith.constant 0 : i32
    %c0_i32_0 = arith.constant 0 : i32
    %c0_i32_1 = arith.constant 0 : i32
    return %c0_i32, %c0_i32_0 : i32, i32
  }
  func.func @transform_2(%arg0: i32) -> (i32, i32) {
    %c0_i32 = arith.constant 0 : i32
    %c0_i32_0 = arith.constant 0 : i32
    %c0_i32_1 = arith.constant 0 : i32
    return %c0_i32, %c0_i32_0 : i32, i32
  }
  func.func @transform_3(%arg0: i32) -> (i32, i32) {
    %c0_i32 = arith.constant 0 : i32
    %c0_i32_0 = arith.constant 0 : i32
    %c0_i32_1 = arith.constant 0 : i32
    return %c0_i32, %c0_i32_0 : i32, i32
  }
  func.func @transform_4(%arg0: i32) -> (i32, i32, i32, i32) {
    %c0_i32 = arith.constant 0 : i32
    %c0_i32_0 = arith.constant 0 : i32
    %c0_i32_1 = arith.constant 0 : i32
    %c0_i32_2 = arith.constant 0 : i32
    return %arg0, %c0_i32, %c0_i32_0, %c0_i32_1 : i32, i32, i32, i32
  }
  func.func @transform_5(%arg0: i32) -> (i32, i32, i32, i32) {
    %c0_i32 = arith.constant 0 : i32
    %c0_i32_0 = arith.constant 0 : i32
    %c0_i32_1 = arith.constant 0 : i32
    %c0_i32_2 = arith.constant 0 : i32
    return %arg0, %c0_i32, %c0_i32_0, %c0_i32_1 : i32, i32, i32, i32
  }
}

</mosaic_0001>

<bundles_post_ra>
// kernel: tpu_custom_call.1
= control target key start
LH: loop header
LB: loop body
LE: loop exit
PB: predicated region body
PF: predicated region fallthrough
CT: control target
= control target key end

     0   :  { %10 = vsyncpa [#allocation4], 0  ;;  %s2185_s0 = inlined_call_operand.vmem [shape: f32[2,32], index: 0, kind: input, shape index: {}]   ;;  %s2186_s1 = inlined_call_operand.vmem [shape: f32[36,32], index: 1, kind: input, shape index: {}]   ;;  %s2187_s2 = inlined_call_operand.vmem [shape: f32[36,1], index: 2, kind: input, shape index: {}]   ;;  %s2188_s3 = inlined_call_operand.vmem [shape: f32[36,64], index: 3, kind: input, shape index: {}]   ;;  %s2189_s4 = inlined_call_operand.hbm [shape: f32[2,4,16,16], index: 4, kind: input, shape index: {}]   ;;  %s2190_s5 = inlined_call_operand.hbm [shape: f32[2,2,16,128], index: 5, kind: output, shape index: {}]  }
   0x1   :  { %12 = vsyncpa [#allocation4 + $0x1], 0 }
   0x2   :  { %13 = vsyncpa [#allocation5], 0 }
   0x3   :  { %15 = vsyncpa [#allocation5 + $0x1], 0  ;;  %s1417_s18 = smov 0   ;;  %s1419_s19 = smov 0  }
   0x4   :  { %s1421_s20 = smov 0   ;;  %s1423_s21 = smov 0  }
   0x5 LB: > { %s1438_s22 = sadd.s32 4294967295, %s1371_s21   ;;  %s1190_s23 = sadd.s32 4294967294, %s1371_s21   ;;  %s1371_s21 = sphi %s1423_s21, %s2200_s21   ;;  %s1367_s20 = sphi %s1421_s20, %s2199_s20   ;;  %s1363_s19 = sphi %s1419_s19, %s2198_s19   ;;  %s1359_s18 = sphi %s1417_s18, %s2197_s18  }
   0x6   : > { %s1442_s24 = sadd.s32 1, %s1371_s21   ;;  %s112_s25 = sadd.s32 1, %s1367_s20 }
   0x7   : > { %s109_s26 = ssub.s32 %s1371_s21, %s1442_s24  ;;  %p119_p0 = scmp.ne.s32.totalorder %s1367_s20, %s1363_s19 }
   0x8   : > { %p110_p1 = scmp.eq.s32.totalorder %s109_s26, 0  ;;  %p120_p2 = scmp.eq.s32.totalorder %s1371_s21, 0 }
   0x9   : > { %p125_p3 = scmp.ne.s32.totalorder %s1363_s19, %s1359_s18  ;;  %p126_p4 = scmp.eq.s32.totalorder %s1438_s22, 0 }
   0xa   : > { %s1454_s27 = scalar_select %p110_p1, %s1367_s20, %s112_s25  }
   0xb   : > { %p1456_p5 = por %p120_p2, %p119_p0  ;;  %p1460_p6 = por %p126_p4, %p125_p3 }
   0xc   : > { %p149_p7 = scmp.eq.s32.totalorder %s1438_s22, 1  ;;  %p155_p8 = scmp.eq.s32.totalorder %s1190_s23, 1 }
   0xd   : > { %p1221_p10 = scmp.lt.s32.totalorder %s1371_s21, 2  ;;  %s187_s7 = sand.u32 1, %s1367_s20  }
   0xe   : > { %p1467_p11 = por %p149_p7, %p119_p0  ;;  %p1471_p12 = por %p155_p8, %p125_p3 }
   0xf   : > { %s1207_s8 = sshll.u32 %s1371_s21, 6  ;;  %s1193_s9 = sshll.u32 %s187_s7, 6 }
  0x10   : > { %s196_s12 = scalar_lea.hbm %s2189_s4, %s1207_s8  ;;  %s191_s14 = scalar_lea.vmem [#allocation3], %s1193_s9 }
  0x11   : > { %s197_s13 = sshll.u32 %s196_s12, 4  ;;  %s199_s15 = sshll.u32 %s191_s14, 4  ;;  %s198_s13 = int_to_ptr.hbm [resolvable:$true] %s197_s13  ;;  %s200_s15 = int_to_ptr.vmem [resolvable:$true] %s199_s15 }
  0x12   : > { %p1482_p13 = pnand %p1221_p10, %p1456_p5  ;;  %p1196_p0 = scmp.ge.s32.totalorder %s1371_s21, 1 }
  0x13   : > { %p207_p1 = scmp.lt.s32.totalorder %s1371_s21, 3  ;;  %s188_s17 = scalar_lea.sflag [#allocation4], %s187_s7 }
  0x14   : > { %s1275_s23 = sshra.s32 %s198_s13, 4  ;;  %p1279_p3 = pneg %p1482_p13  ;;  %s1276_s23 = int_to_ptr.hbm [resolvable:$true] %s1275_s23 }
  0x15   : > { %s1277_s25 = scalar_lea.hbm %s1276_s23, 64  ;;  %s1282_s28 = scalar_lea.hbm %s2189_s4, 128 }
  0x16   : > { %p1278_p2 = scmp.ne.s32.totalorder %s1276_s23, %s1277_s25  ;;  %p1283_p5 = scmp.lt.s32.totalorder %s1276_s23, %s2189_s4 }
  0x17   : > { %p1284_p8 = scmp.lt.s32.totalorder %s1282_s28, %s1277_s25 }
  0x18   : > { %p1280_p4 = pnand %p1279_p3, %p1278_p2 }
  0x19   : > { %p1285_p10 = por %p1284_p8, %p1283_p5 }
  0x1a   : > { %p1281_p7 = pneg %p1280_p4 }
  0x1c   : > { %p1286_p9 = pnand %p1285_p10, %p1281_p7 }
  0x1e   : > { %1289 = shalt.err (!%p1286_p9)
}
  0x1f   : > { %s1373_s7 = smov 128   ;;  %s1374_s11 = smov 8  }
  0x20   : > { %1216 = dma.hbm_to_vmem [thread:$0]  (!%p1482_p13), %s198_s13, 1024, %s200_s15, %s188_s17, %s1373_s7, %s1373_s7, %s1374_s11  }
  0x21   : > { %p208_p2 = pnand %p1196_p0, %p207_p1 }
  0x22   : > { %s1503_s12 = sand.u32 (!%p208_p2), 1, %s1363_s19  }
  0x23   : > { %211 = sbr.rel (%p208_p2) target bundleno = 561 (0x231), region = 40  ;;  %s1197_s14 = sshll.u32 (!%p208_p2), %s1503_s12, 6 }
  0x24   : > { %s214_s23 = scalar_lea.sflag (!%p208_p2), [#allocation4], %s1503_s12  ;;  %s1507_s25 = scalar_lea.vmem (!%p208_p2), [#allocation3], %s1197_s14 }
  0x28   : > { %1350 = dma.done.wait (%p1460_p6), %s214_s23, 1024  }
  0x29   : > { %1352 = vsyncadd (%p1460_p6), %s214_s23, 4294966272  ;;  %vm373_vm0 = vcmask 138240   ;;  %v1375_v0 = vmov 0.0   ;;  %s245_s16 = scalar_lea.vmem %s2185_s0, %s1438_s22  ;;  %vm395_vm1 = vcmask 130048   ;;  %v251_v1 = vld [vmem:[%s2186_s1 + $0x20] sm:$0xf] }
  0x2a   : > { %374 = vst.msk [vmem:[#allocation2] sm:$0xff] %vm373_vm0, %v1375_v0  ;;  %v1272_v2 = vld [vmem:[%s245_s16] ss:$0 sm:$0xff]  ;;  %vm271_vm2 = vcmask 257024   ;;  %v249_v3 = vld [vmem:[%s2186_s1 + $0x10] sm:$0xff]  ;;  %vm258_vm3 = vcmask 261120  }
  0x2b   : > { %375 = vst.msk [vmem:[#allocation2 + $0x8] sm:$0xff] %vm373_vm0, %v1375_v0  ;;  %v247_v4 = vld [vmem:[%s2186_s1] sm:$0xff]  ;;  %v257_v5 = vmul.f32 %v1272_v2, %v251_v1  ;;  %v255_v6 = vmul.f32 %v1272_v2, %v249_v3  ;;  %v388_v9 = vld [vmem:[%s1507_s25 + $0x8] sm:$0xff]  ;;  %v250_v10 = vld [vmem:[%s2186_s1 + $0x18] sm:$0xff]  ;;  %vm376_vm4 = vcmask 131072   ;;  %s1376_s23 = smov 16  }
  0x2c   : > { %378 = vst.msk [vmem:[#allocation2 + $0x18] sm:$0xff] %vm373_vm0, %v1375_v0  ;;  %v253_v7 = vmul.f32 %v1272_v2, %v247_v4  ;;  %v387_v8 = vld [vmem:[%s1507_s25] sm:$0xff]  ;;  %v248_v14 = vld [vmem:[%s2186_s1 + $0x8] sm:$0xff]  ;;  %v256_v15 = vmul.f32 %v1272_v2, %v250_v10  ;;  %s1377_s13 = smov 32   ;;  %s1378_s15 = smov 48   ;;  %v389_v22 = vld [vmem:[%s1507_s25 + $0x10] sm:$0xff] }
  0x2d   : > { %379 = vst.msk [vmem:[#allocation2 + $0x20] sm:$0xff] %vm373_vm0, %v1375_v0  ;;  %v272_v11 = vsel %vm271_vm2, %v257_v5, 0.0  ;;  %v265_v12 = vsel %vm258_vm3, %v255_v6, 0.0  ;;  %v254_v16 = vmul.f32 %v1272_v2, %v248_v14  ;;  %s1379_s16 = smov 127   ;;  %v390_v23 = vld [vmem:[%s1507_s25 + $0x18] sm:$0xff]  ;;  %s1380_s29 = smov 15  }
  0x2e   : > { %381 = vst.msk [vmem:[#allocation2 + $0x30] sm:$0xff] %vm373_vm0, %v1375_v0  ;;  %v259_v13 = vsel %vm258_vm3, %v253_v7, 0.0  ;;  %273 = vadd.xlane.f32.xlu2 %v272_v11  ;;  %266 = vadd.xlane.f32.xlu1 %v265_v12  ;;  %v268_v17 = vsel %vm258_vm3, %v256_v15, 0.0  ;;  %s1381_s17 = smov 31   ;;  %s1382_s26 = smov 47   ;;  %v1383_v26 = vmov 0  }
  0x2f   : > { %382 = vst.msk [vmem:[#allocation2 + $0x38] sm:$0xff] %vm373_vm0, %v1375_v0  ;;  %260 = vadd.xlane.f32.xlu0 %v259_v13  ;;  %v262_v18 = vsel %vm258_vm3, %v254_v16, 0.0  ;;  %1269 = vset.pattern.permute.xlu2 %v1383_v26  ;;  %v280_v30 = vld [vmem:[%s2187_s2] sm:$0xff]  ;;  %v282_v34 = vld [vmem:[%s2187_s2 + $0x10] sm:$0xff]  ;;  %v283_v40 = vld [vmem:[%s2187_s2 + $0x18] sm:$0xff]  ;;  %vm443_vm5 = vcmask 392192  }
  0x30   : > { %384 = vst.msk [vmem:[#allocation2 + $0x48] sm:$0xff] %vm373_vm0, %v1375_v0  ;;  %1271 = vset.pattern.permute.xlu1 %v1383_v26  ;;  %1270 = vset.pattern.permute.xlu0 %v1383_v26  ;;  %v391_v38 = vld [vmem:[%s1507_s25 + $0x20] sm:$0xff]  ;;  %v281_v43 = vld [vmem:[%s2187_s2 + $0x8] sm:$0xff]  ;;  %v393_v26 = vld [vmem:[%s1507_s25 + $0x30] sm:$0xff]  ;;  %vm340_vm6 = vcmask 523264   ;;  %vm348_vm7 = vcmask 519168  }
  0x31   : > { %385 = vst.msk [vmem:[#allocation2 + $0x50] sm:$0xff] %vm373_vm0, %v1375_v0  ;;  %v284_v50 = vld [vmem:[%s2187_s2 + $0x20] sm:$0xf]  ;;  %v392_v54 = vld [vmem:[%s1507_s25 + $0x28] sm:$0xff]  ;;  %vm464_vm11 = vcmask 1040384   ;;  %s1325_s28 = scalar_lea.hbm %s2190_s5, 64 }
  0x32   : > { %396 = vst.msk [vmem:[#allocation2] sm:$0xff] %vm395_vm1, %v387_v8 }
  0x33   : > { %397 = vst.msk [vmem:[#allocation2 + $0x8] sm:$0xff] %vm395_vm1, %v388_v9 }
  0x34   : > { %377 = vst.msk [vmem:[#allocation2 + $0x10] sm:$0x1] %vm376_vm4, %v1375_v0 }
  0x35   : > { %380 = vst.msk [vmem:[#allocation2 + $0x28] sm:$0x1] %vm376_vm4, %v1375_v0 }
  0x36   : > { %383 = vst.msk [vmem:[#allocation2 + $0x40] sm:$0x1] %vm376_vm4, %v1375_v0  ;;  %269 = vadd.xlane.f32.xlu1 %v268_v17 }
  0x37   : > { %386 = vst.msk [vmem:[#allocation2 + $0x58] sm:$0x1] %vm376_vm4, %v1375_v0  ;;  %263 = vadd.xlane.f32.xlu0 %v262_v18 }
  0x38   : > { %398 = vst.msk [vmem:[#allocation2 + $0x18] sm:$0xff] %vm395_vm1, %v389_v22 }
  0x39   : > { %v1552_v20 = vld [vmem:[#allocation2] sm:$0xff]  ;;  %399 = vst.msk [vmem:[#allocation2 + $0x20] sm:$0xff] %vm395_vm1, %v390_v23 }
  0x3a   : > { %v1548_v19 = vld [vmem:[#allocation2 + $0x8] sm:$0xff]  ;;  %400 = vst.msk [vmem:[#allocation2 + $0x30] sm:$0xff] %vm395_vm1, %v391_v38 }
  0x3b   : > { %v1562_v21 = vld [vmem:[#allocation2 + $0x10] sm:$0x1]  ;;  %401 = vst.msk [vmem:[#allocation2 + $0x38] sm:$0xff] %vm395_vm1, %v392_v54 }
  0x3c   : > { %v1614_v27 = vld [vmem:[#allocation2 + $0x28] sm:$0x1]  ;;  %402 = vst.msk [vmem:[#allocation2 + $0x48] sm:$0xff] %vm395_vm1, %v393_v26 }
  0x3d   : > { %v1678_v7 = vld [vmem:[#allocation2 + $0x40] sm:$0x1] }
  0x3f   : > { %v1596_v24 = vld [vmem:[#allocation2 + $0x18] sm:$0xff] }
  0x40   : > { %v1600_v25 = vld [vmem:[#allocation2 + $0x20] sm:$0xff] }
  0x41   : > { %v1680_v9 = vld [vmem:[#allocation2 + $0x30] sm:$0xff] }
  0x42   : > { %v1693_v17 = vld [vmem:[#allocation2 + $0x38] sm:$0xff] }
  0x46   : > { %412 = vrot.lane.b32.xlu2 %v1548_v19, %s1376_s23 }
  0x4b   : > { %419 = vrot.lane.b32.xlu0 %v1552_v20, %s1377_s13 }
  0x4e   : > { %421 = vrot.lane.b32.xlu2 %v1548_v19, %s1377_s13 }
  0x4f   : > { %410 = vrot.lane.b32.xlu1 %v1552_v20, %s1376_s23 }
  0x53   : > { %428 = vrot.lane.b32.xlu0 %v1552_v20, %s1378_s15 }
  0x56   : > { %430 = vrot.lane.b32.xlu2 %v1548_v19, %s1378_s15 }
  0x57   : > { %414 = vrot.lane.b32.xlu1 %v1562_v21, %s1376_s23 }
  0x5b   : > { %474 = vrot.lane.b32.xlu0 %v1552_v20, %s1379_s16 }
  0x5e   : > { %476 = vrot.lane.b32.xlu2 %v1548_v19, %s1379_s16 }
  0x5f   : > { %423 = vrot.lane.b32.xlu1 %v1562_v21, %s1377_s13 }
  0x63   : > { %483 = vrot.lane.b32.xlu0 %v1552_v20, %s1380_s29 }
  0x66   : > { %485 = vrot.lane.b32.xlu2 %v1548_v19, %s1380_s29 }
  0x67   : > { %432 = vrot.lane.b32.xlu1 %v1562_v21, %s1378_s15 }
  0x6b   : > { %492 = vrot.lane.b32.xlu0 %v1552_v20, %s1381_s17 }
  0x6e   : > { %494 = vrot.lane.b32.xlu2 %v1548_v19, %s1381_s17 }
  0x6f   : > { %478 = vrot.lane.b32.xlu1 %v1562_v21, %s1379_s16 }
  0x73   : > { %501 = vrot.lane.b32.xlu0 %v1552_v20, %s1382_s26 }
  0x76   : > { %503 = vrot.lane.b32.xlu2 %v1548_v19, %s1382_s26 }
  0x77   : > { %487 = vrot.lane.b32.xlu1 %v1562_v21, %s1380_s29 }
  0x7b   : > { %578 = vrot.lane.b32.xlu0 %v1596_v24, %s1376_s23 }
  0x7e   : > { %580 = vrot.lane.b32.xlu2 %v1600_v25, %s1376_s23 }
  0x7f   : > { %496 = vrot.lane.b32.xlu1 %v1562_v21, %s1381_s17 }
  0x83   : > { %587 = vrot.lane.b32.xlu0 %v1596_v24, %s1377_s13 }
  0x86   : > { %589 = vrot.lane.b32.xlu2 %v1600_v25, %s1377_s13 }
  0x87   : > { %505 = vrot.lane.b32.xlu1 %v1562_v21, %s1382_s26 }
  0x8b   : > { %596 = vrot.lane.b32.xlu0 %v1596_v24, %s1378_s15 }
  0x8e   : > { %598 = vrot.lane.b32.xlu2 %v1600_v25, %s1378_s15 }
  0x8f   : > { %582 = vrot.lane.b32.xlu1 %v1614_v27, %s1376_s23 }
  0x93   : > { %640 = vrot.lane.b32.xlu0 %v1596_v24, %s1379_s16 }
  0x96   : > { %642 = vrot.lane.b32.xlu2 %v1600_v25, %s1379_s16 }
  0x97   : > { %591 = vrot.lane.b32.xlu1 %v1614_v27, %s1377_s13 }
  0x9f   : > { %600 = vrot.lane.b32.xlu1 %v1614_v27, %s1378_s15 }
  0xa1   : > { %v274_v28 = vpop.xlane.xlu2 %273  ;;  %v267_v29 = vpop.xlane.xlu1 %266 }
  0xa2   : > { %v261_v31 = vpop.xlane.xlu0 %260  ;;  %v277_v32 = vmul.f32 0.17677669, %v267_v29  ;;  %v279_v48 = vmul.f32 0.17677669, %v274_v28 }
  0xa3   : > { %v275_v33 = vmul.f32 0.17677669, %v261_v31 }
  0xa4   : > { %v287_v36 = vadd.f32 %v282_v34, %v277_v32  ;;  %v289_v55 = vadd.f32 %v284_v50, %v279_v48 }
  0xa5   : > { %v285_v35 = vadd.f32 %v280_v30, %v275_v33  ;;  %v394_v33 = vld [vmem:[%s1507_s25 + $0x38] sm:$0xff] }
  0xa6   : > { %v292_v45 = vadd.f32 1.0, %v287_v36  ;;  %v294_v58 = vadd.f32 1.0, %v289_v55  ;;  %403 = vst.msk [vmem:[#allocation2 + $0x50] sm:$0xff] %vm395_vm1, %v394_v33 }
  0xa7   : > { %v290_v37 = vadd.f32 1.0, %v285_v35  ;;  %644 = vrot.lane.b32.xlu1 %v1614_v27, %s1379_s16 }
  0xa9   : > { %302 = vperm.xlu2 %1269, %v290_v37   ;;  %v413_v39 = vpop.permute.xlu2 %412  ;;  %v270_v41 = vpop.xlane.xlu1 %269 }
  0xaa   : > { %v278_v42 = vmul.f32 0.17677669, %v270_v41  ;;  %v264_v44 = vpop.xlane.xlu0 %263  ;;  %v438_v52 = vsel %vm395_vm1, %v1548_v19, %v413_v39 }
  0xab   : > { %v276_v46 = vmul.f32 0.17677669, %v264_v44 }
  0xac   : > { %v288_v47 = vadd.f32 %v283_v40, %v278_v42 }
  0xad   : > { %v286_v49 = vadd.f32 %v281_v43, %v276_v46 }
  0xae   : > { %v293_v51 = vadd.f32 1.0, %v288_v47 }
  0xaf   : > { %v291_v53 = vadd.f32 1.0, %v286_v49  ;;  %312 = vperm.xlu1 %1271, %v292_v45  }
  0xb1   : > { %317 = vperm.xlu2 %1269, %v293_v51   ;;  %307 = vperm.xlu0 %1270, %v291_v53   ;;  %v422_v56 = vpop.permute.xlu2 %421  ;;  %v1762_v51 = vld [vmem:[#allocation2 + $0x48] sm:$0xff] }
  0xb2   : > { %v441_v57 = vsel %vm258_vm3, %v438_v52, %v422_v56  ;;  %v1773_v56 = vld [vmem:[#allocation2 + $0x58] sm:$0x1] }
  0xb7   : > { %653 = vrot.lane.b32.xlu1 %v1614_v27, %s1380_s29 }
  0xb9   : > { %322 = vperm.xlu2 %1269, %v294_v58   ;;  %649 = vrot.lane.b32.xlu0 %v1596_v24, %s1380_s29  ;;  %v431_v59 = vpop.permute.xlu2 %430 }
  0xba   : > { %v1657_v60 = vsel %vm443_vm5, %v441_v57, %v431_v59  ;;  %v1775_v57 = vld [vmem:[#allocation2 + $0x50] sm:$0xff] }
  0xbd   : > { %v420_v61 = vpop.permute.xlu0 %419 }
  0xbf   : > { %662 = vrot.lane.b32.xlu1 %v1614_v27, %s1381_s17 }
  0xc1   : > { %651 = vrot.lane.b32.xlu2 %v1600_v25, %s1380_s29  ;;  %658 = vrot.lane.b32.xlu0 %v1596_v24, %s1381_s17  ;;  %v477_v62 = vpop.permute.xlu2 %476  ;;  %v411_v63 = vpop.permute.xlu1 %410 }
  0xc2   : > { %v437_v0 = vsel %vm395_vm1, %v1552_v20, %v411_v63  ;;  %v295_v63 = vld [vmem:[%s2188_s3] sm:$0xff] }
  0xc3   : > { %v440_v1 = vsel %vm258_vm3, %v437_v0, %v420_v61 }
  0xc5   : > { %v429_v2 = vpop.permute.xlu0 %428 }
  0xc6   : > { %v1669_v3 = vsel %vm443_vm5, %v440_v1, %v429_v2 }
  0xc7   : > { %671 = vrot.lane.b32.xlu1 %v1614_v27, %s1382_s26 }
  0xc9   : > { %660 = vrot.lane.b32.xlu2 %v1600_v25, %s1381_s17  ;;  %667 = vrot.lane.b32.xlu0 %v1596_v24, %s1382_s26  ;;  %v486_v4 = vpop.permute.xlu2 %485  ;;  %v415_v5 = vpop.permute.xlu1 %414 }
  0xca   : > { %v511_v6 = vsel %vm395_vm1, %v477_v62, %v486_v4  ;;  %v439_v10 = vsel %vm395_vm1, %v1562_v21, %v415_v5  ;;  %v298_v4 = vld [vmem:[%s2188_s3 + $0x18] sm:$0xff]  ;;  %v297_v5 = vld [vmem:[%s2188_s3 + $0x10] sm:$0xff] }
  0xcd   : > { %v475_v8 = vpop.permute.xlu0 %474 }
  0xcf   : > { %748 = vrot.lane.b32.xlu1 %v1678_v7, %s1376_s23 }
  0xd1   : > { %669 = vrot.lane.b32.xlu2 %v1600_v25, %s1382_s26  ;;  %744 = vrot.lane.b32.xlu0 %v1680_v9, %s1376_s23  ;;  %v495_v11 = vpop.permute.xlu2 %494  ;;  %v424_v12 = vpop.permute.xlu1 %423 }
  0xd2   : > { %v514_v13 = vsel %vm258_vm3, %v511_v6, %v495_v11  ;;  %v442_v14 = vsel %vm258_vm3, %v439_v10, %v424_v12  ;;  %v296_v11 = vld [vmem:[%s2188_s3 + $0x8] sm:$0xff] }
  0xd5   : > { %v484_v15 = vpop.permute.xlu0 %483 }
  0xd6   : > { %v510_v16 = vsel %vm395_vm1, %v475_v8, %v484_v15  ;;  %v299_v8 = vld [vmem:[%s2188_s3 + $0x20] sm:$0xf] }
  0xd7   : > { %757 = vrot.lane.b32.xlu1 %v1678_v7, %s1377_s13 }
  0xd9   : > { %746 = vrot.lane.b32.xlu2 %v1693_v17, %s1376_s23  ;;  %753 = vrot.lane.b32.xlu0 %v1680_v9, %s1377_s13  ;;  %v504_v18 = vpop.permute.xlu2 %503  ;;  %v433_v19 = vpop.permute.xlu1 %432 }
  0xda   : > { %v1702_v20 = vsel %vm443_vm5, %v514_v13, %v504_v18  ;;  %v1705_v21 = vsel %vm443_vm5, %v442_v14, %v433_v19 }
  0xdd   : > { %v493_v22 = vpop.permute.xlu0 %492 }
  0xde   : > { %v513_v23 = vsel %vm258_vm3, %v510_v16, %v493_v22 }
  0xdf   : > { %766 = vrot.lane.b32.xlu1 %v1678_v7, %s1378_s15 }
  0xe1   : > { %755 = vrot.lane.b32.xlu2 %v1693_v17, %s1377_s13  ;;  %762 = vrot.lane.b32.xlu0 %v1680_v9, %s1378_s15  ;;  %v479_v28 = vpop.permute.xlu1 %478  ;;  %v581_v29 = vpop.permute.xlu2 %580 }
  0xe2   : > { %v606_v32 = vsel %vm395_vm1, %v1600_v25, %v581_v29 }
  0xe5   : > { %v502_v30 = vpop.permute.xlu0 %501 }
  0xe6   : > { %v1717_v31 = vsel %vm443_vm5, %v513_v23, %v502_v30 }
  0xe7   : > { %810 = vrot.lane.b32.xlu1 %v1678_v7, %s1379_s16 }
  0xe9   : > { %764 = vrot.lane.b32.xlu2 %v1693_v17, %s1378_s15  ;;  %806 = vrot.lane.b32.xlu0 %v1680_v9, %s1379_s16  ;;  %v488_v34 = vpop.permute.xlu1 %487  ;;  %v590_v35 = vpop.permute.xlu2 %589 }
  0xea   : > { %v512_v36 = vsel %vm395_vm1, %v479_v28, %v488_v34  ;;  %v609_v37 = vsel %vm258_vm3, %v606_v32, %v590_v35 }
  0xed   : > { %v579_v38 = vpop.permute.xlu0 %578 }
  0xee   : > { %v605_v42 = vsel %vm395_vm1, %v1596_v24, %v579_v38 }
  0xef   : > { %819 = vrot.lane.b32.xlu1 %v1678_v7, %s1380_s29 }
  0xf1   : > { %808 = vrot.lane.b32.xlu2 %v1693_v17, %s1379_s16  ;;  %815 = vrot.lane.b32.xlu0 %v1680_v9, %s1380_s29  ;;  %v497_v25 = vpop.permute.xlu1 %496  ;;  %v599_v39 = vpop.permute.xlu2 %598 }
  0xf2   : > { %v515_v40 = vsel %vm258_vm3, %v512_v36, %v497_v25  ;;  %v1739_v41 = vsel %vm443_vm5, %v609_v37, %v599_v39 }
  0xf5   : > { %v588_v43 = vpop.permute.xlu0 %587 }
  0xf6   : > { %v608_v44 = vsel %vm258_vm3, %v605_v42, %v588_v43 }
  0xf7   : > { %828 = vrot.lane.b32.xlu1 %v1678_v7, %s1381_s17 }
  0xf9   : > { %817 = vrot.lane.b32.xlu2 %v1693_v17, %s1380_s29  ;;  %824 = vrot.lane.b32.xlu0 %v1680_v9, %s1381_s17  ;;  %v506_v45 = vpop.permute.xlu1 %505  ;;  %v643_v46 = vpop.permute.xlu2 %642 }
  0xfa   : > { %v1751_v47 = vsel %vm443_vm5, %v515_v40, %v506_v45 }
  0xfd   : > { %v597_v48 = vpop.permute.xlu0 %596 }
  0xfe   : > { %v1754_v24 = vsel %vm443_vm5, %v608_v44, %v597_v48 }
  0xff   : > { %837 = vrot.lane.b32.xlu1 %v1678_v7, %s1382_s26 }
 0x101   : > { %826 = vrot.lane.b32.xlu2 %v1693_v17, %s1381_s17  ;;  %833 = vrot.lane.b32.xlu0 %v1680_v9, %s1382_s26  ;;  %v583_v49 = vpop.permute.xlu1 %582 }
 0x102   : > { %v607_v52 = vsel %vm395_vm1, %v1614_v27, %v583_v49 }
 0x103   : > { %v303_v50 = vpop.permute.xlu2 %302 }
 0x104   : > { %v325_v2 = vmul.f32 %v303_v50, %v295_v63 }
 0x105   : > { %v641_v62 = vpop.permute.xlu0 %640 }
 0x106   : > { %v1804_v6 = vmul.f32 0.16666667, %v325_v2 }
 0x107   : > { %981 = vrot.lane.b32.xlu1 %v1762_v51, %s1380_s29 }
 0x108   : > { %v335_v23 = vmul.f32 %v1804_v6, %v1804_v6 }
 0x109   : > { %835 = vrot.lane.b32.xlu2 %v1693_v17, %s1382_s26  ;;  %972 = vrot.lane.b32.xlu0 %v1762_v51, %s1379_s16  ;;  %v592_v53 = vpop.permute.xlu1 %591 }
 0x10a   : > { %v610_v54 = vsel %vm258_vm3, %v607_v52, %v592_v53  ;;  %v341_v33 = vsel %vm340_vm6, %v335_v23, 0.0 }
 0x10b   : > { %v318_v55 = vpop.permute.xlu2 %317 }
 0x10c   : > { %v328_v12 = vmul.f32 %v318_v55, %v298_v4 }
 0x10e   : > { %v1821_v26 = vmul.f32 0.16666667, %v328_v12 }
 0x10f   : > { %985 = vrot.lane.b32.xlu1 %v1773_v56, %s1380_s29 }
 0x110   : > { %v338_v35 = vmul.f32 %v1821_v26, %v1821_v26 }
 0x111   : > { %974 = vrot.lane.b32.xlu2 %v1775_v57, %s1379_s16  ;;  %983 = vrot.lane.b32.xlu0 %v1775_v57, %s1380_s29  ;;  %v601_v27 = vpop.permute.xlu1 %600 }
 0x112   : > { %v1784_v58 = vsel %vm443_vm5, %v610_v54, %v601_v27 }
 0x113   : > { %v323_v59 = vpop.permute.xlu2 %322 }
 0x114   : > { %v329_v16 = vmul.f32 %v323_v59, %v299_v8 }
 0x116   : > { %v1829_v30 = vmul.f32 0.16666667, %v329_v16 }
 0x117   : > { %994 = vrot.lane.b32.xlu1 %v1773_v56, %s1381_s17 }
 0x118   : > { %v339_v42 = vmul.f32 %v1829_v30, %v1829_v30 }
 0x119   : > { %976 = vrot.lane.b32.xlu2 %v1773_v56, %s1379_s16  ;;  %990 = vrot.lane.b32.xlu0 %v1762_v51, %s1381_s17  ;;  %v645_v61 = vpop.permute.xlu1 %644 }
 0x11a   : > { %v349_v49 = vsel %vm348_vm7, %v339_v42, 0.0 }
 0x11b   : > { %v652_v0 = vpop.permute.xlu2 %651 }
 0x11c   : > { %v677_v1 = vsel %vm395_vm1, %v643_v46, %v652_v0  ;;  %v346_v46 = vsel %vm340_vm6, %v338_v35, 0.0 }
 0x11f   : > { %1003 = vrot.lane.b32.xlu1 %v1773_v56, %s1382_s26 }
 0x121   : > { %992 = vrot.lane.b32.xlu2 %v1775_v57, %s1381_s17  ;;  %999 = vrot.lane.b32.xlu0 %v1762_v51, %s1382_s26  ;;  %v313_v10 = vpop.permute.xlu1 %312  ;;  %s1208_s17 = sshll.u32 %s1438_s22, 5  ;;  %s1101_s22 = scalar_lea.sflag [#allocation5], %s1503_s12 }
 0x122   : > { %v327_v13 = vmul.f32 %v313_v10, %v297_v5  ;;  %s1112_s10 = scalar_lea.hbm %s2190_s5, %s1208_s17 }
 0x123   : > { %v661_v14 = vpop.permute.xlu2 %660  ;;  %v308_v15 = vpop.permute.xlu0 %307  ;;  %s1115_s7 = sshll.u32 %s1112_s10, 4  ;;  %s1116_s7 = int_to_ptr.hbm [resolvable:$true] %s1115_s7 }
 0x124   : > { %v1816_v18 = vmul.f32 0.16666667, %v327_v13  ;;  %v680_v19 = vsel %vm258_vm3, %v677_v1, %v661_v14  ;;  %v326_v22 = vmul.f32 %v308_v15, %v296_v11  ;;  %s1319_s16 = sshra.s32 %s1116_s7, 4  ;;  %s1320_s16 = int_to_ptr.hbm [resolvable:$true] %s1319_s16 }
 0x125   : > { %s1321_s11 = scalar_lea.hbm %s1320_s16, 32  ;;  %p1326_p0 = scmp.lt.s32.totalorder %s1320_s16, %s2190_s5 }
 0x126   : > { %v337_v28 = vmul.f32 %v1816_v18, %v1816_v18  ;;  %v1825_v29 = vmul.f32 0.16666667, %v326_v22  ;;  %p1322_p6 = scmp.ne.s32.totalorder %s1320_s16, %s1321_s11  ;;  %p1327_p1 = scmp.lt.s32.totalorder %s1325_s28, %s1321_s11 }
 0x127   : > { %914 = vrot.lane.b32.xlu1 %v1773_v56, %s1376_s23 }
 0x128   : > { %v336_v32 = vmul.f32 %v1825_v29, %v1825_v29  ;;  %v344_v36 = vsel %vm340_vm6, %v337_v28, 0.0  ;;  %p1323_p9 = pnand %p1322_p6, %p1467_p11  ;;  %p1328_p3 = por %p1327_p1, %p1326_p0 }
 0x129   : > { %1001 = vrot.lane.b32.xlu2 %v1775_v57, %s1382_s26  ;;  %910 = vrot.lane.b32.xlu0 %v1762_v51, %s1376_s23  ;;  %v654_v34 = vpop.permute.xlu1 %653 }
 0x12a   : > { %v342_v37 = vsel %vm340_vm6, %v336_v32, 0.0  ;;  %v678_v38 = vsel %vm395_vm1, %v645_v61, %v654_v34  ;;  %p1324_p13 = pneg %p1323_p9 }
 0x12b   : > { %v343_v25 = vadd.f32 %v342_v37, %v341_v33  ;;  %v670_v39 = vpop.permute.xlu2 %669  ;;  %v650_v40 = vpop.permute.xlu0 %649 }
 0x12c   : > { %v1846_v43 = vsel %vm443_vm5, %v680_v19, %v670_v39  ;;  %v676_v44 = vsel %vm395_vm1, %v641_v62, %v650_v40  ;;  %p1329_p4 = pnand %p1328_p3, %p1324_p13 }
 0x12d   : > { %v345_v45 = vadd.f32 %v344_v36, %v343_v25 }
 0x12f   : > { %v347_v48 = vadd.f32 %v346_v46, %v345_v45  ;;  %923 = vrot.lane.b32.xlu1 %v1773_v56, %s1377_s13 }
 0x131   : > { %v350_v50 = vadd.f32 %v349_v49, %v347_v48  ;;  %912 = vrot.lane.b32.xlu2 %v1775_v57, %s1376_s23  ;;  %919 = vrot.lane.b32.xlu0 %v1762_v51, %s1377_s13  ;;  %v663_v52 = vpop.permute.xlu1 %662  ;;  %s1384_s23 = smov 64  }
 0x132   : > { %v681_v53 = vsel %vm258_vm3, %v678_v38, %v663_v52 }
 0x133   : > { %v351_v54 = vrot.slane %v350_v50, 4  ;;  %v747_v55 = vpop.permute.xlu2 %746  ;;  %v659_v27 = vpop.permute.xlu0 %658 }
 0x134   : > { %v679_v59 = vsel %vm258_vm3, %v676_v44, %v659_v27  ;;  %v772_v0 = vsel %vm395_vm1, %v1693_v17, %v747_v55 }
 0x135   : > { %v352_v61 = vadd.f32 %v351_v54, %v350_v50 }
 0x137   : > { %v353_v62 = vrot.slane %v352_v61, 2  ;;  %932 = vrot.lane.b32.xlu1 %v1773_v56, %s1378_s15 }
 0x139   : > { %v354_v63 = vadd.f32 %v353_v62, %v352_v61  ;;  %921 = vrot.lane.b32.xlu2 %v1775_v57, %s1377_s13  ;;  %928 = vrot.lane.b32.xlu0 %v1762_v51, %s1378_s15  ;;  %v672_v1 = vpop.permute.xlu1 %671  ;;  %s1198_s13 = sshll.u32 %s1503_s12, 5 }
 0x13a   : > { %v1867_v2 = vsel %vm443_vm5, %v681_v53, %v672_v1 }
 0x13b   : > { %v355_v4 = vrot.slane %v354_v63, 1  ;;  %v756_v5 = vpop.permute.xlu2 %755  ;;  %v668_v8 = vpop.permute.xlu0 %667 }
 0x13c   : > { %v775_v10 = vsel %vm258_vm3, %v772_v0, %v756_v5  ;;  %v1871_v11 = vsel %vm443_vm5, %v679_v59, %v668_v8 }
 0x13d   : > { %v356_v12 = vadd.f32 %v355_v4, %v354_v63 }
 0x13f   : > { %v357_v17 = vadd.f32 1e-08, %v356_v12 }
 0x141   : > { %1273 = vrsqrt.f32 %v357_v17  ;;  %930 = vrot.lane.b32.xlu2 %v1775_v57, %s1378_s15  ;;  %v749_v13 = vpop.permute.xlu1 %748  ;;  %vm364_vm9 = vweird.f32 %v357_v17  ;;  %s244_s15 = scalar_lea.vmem [#allocation6], %s1198_s13 }
 0x142   : > { %v773_v22 = vsel %vm395_vm1, %v1678_v7, %v749_v13  ;;  %s1113_s29 = sshll.u32 %s244_s15, 4  ;;  %s1114_s29 = int_to_ptr.vmem [resolvable:$true] %s1113_s29 }
 0x143   : > { %v765_v14 = vpop.permute.xlu2 %764  ;;  %v745_v15 = vpop.permute.xlu0 %744 }
 0x144   : > { %v1876_v16 = vsel %vm443_vm5, %v775_v10, %v765_v14  ;;  %v771_v34 = vsel %vm395_vm1, %v1680_v9, %v745_v15 }
 0x147   : > { %v1274_v19 = vpop.eup %1273 }
 0x148   : > { %v359_v23 = vmul.f32 %v1274_v19, %v357_v17  ;;  %vm365_vm8 = vweird.f32 %v1274_v19 }
 0x149   : > { %v758_v28 = vpop.permute.xlu1 %757  ;;  %vm366_vm10 = vmor %vm364_vm9, %vm365_vm8 }
 0x14a   : > { %v360_v32 = vmul.f32 %v1274_v19, %v359_v23  ;;  %v776_v33 = vsel %vm258_vm3, %v773_v22, %v758_v28 }
 0x14b   : > { %v809_v35 = vpop.permute.xlu2 %808  ;;  %v754_v36 = vpop.permute.xlu0 %753 }
 0x14c   : > { %v361_v37 = vmul.f32 0.5, %v360_v32  ;;  %v774_v38 = vsel %vm258_vm3, %v771_v34, %v754_v36 }
 0x14e   : > { %v362_v25 = vsub.f32 1.5, %v361_v37 }
 0x150   : > { %v363_v39 = vmul.f32 %v1274_v19, %v362_v25 }
 0x151   : > { %v767_v40 = vpop.permute.xlu1 %766 }
 0x152   : > { %v367_v7 = vsel %vm366_vm10, %v1274_v19, %v363_v39  ;;  %v1885_v42 = vsel %vm443_vm5, %v776_v33, %v767_v40 }
 0x153   : > { %v1888_v44 = vmul.f32 %v367_v7, %v1804_v6  ;;  %v1891_v9 = vmul.f32 %v367_v7, %v1825_v29  ;;  %v1894_v45 = vmul.f32 %v367_v7, %v1821_v26  ;;  %v818_v46 = vpop.permute.xlu2 %817  ;;  %v763_v48 = vpop.permute.xlu0 %762  ;;  %v1897_v49 = vmul.f32 %v367_v7, %v1816_v18 }
 0x154   : > { %v1900_v50 = vsel %vm395_vm1, %v809_v35, %v818_v46  ;;  %v1903_v52 = vsel %vm443_vm5, %v774_v38, %v763_v48  ;;  %v1906_v6 = vmul.f32 %v367_v7, %v1829_v30 }
 0x155   : > { %v519_v29 = vperm.slane %v1888_v44, 3  ;;  %v524_v26 = vperm.slane %v1888_v44, 0  ;;  %v531_v53 = vperm.slane %v1888_v44, 6  ;;  %v545_v54 = vperm.slane %v1888_v44, 5 }
 0x156   : > { %v550_v18 = vperm.slane %v1888_v44, 2  ;;  %v557_v55 = vperm.slane %v1891_v9, 0  ;;  %v685_v27 = vperm.slane %v1891_v9, 4  ;;  %v690_v59 = vperm.slane %v1891_v9, 1 }
 0x157   : > { %v521_v61 = vmul.f32 %v519_v29, %v1702_v20  ;;  %v526_v30 = vmul.f32 %v524_v26, %v1702_v20  ;;  %v532_v62 = vmul.f32 %v531_v53, %v1717_v31  ;;  %v533_v63 = vmul.f32 %v531_v53, %v1702_v20 }
 0x158   : > { %v547_v0 = vmul.f32 %v545_v54, %v1657_v60  ;;  %v552_v1 = vmul.f32 %v550_v18, %v1657_v60  ;;  %v558_v4 = vmul.f32 %v557_v55, %v1669_v3  ;;  %v559_v5 = vmul.f32 %v557_v55, %v1657_v60 }
 0x159   : > { %v536_v8 = vrot.slane %v532_v62, 7  ;;  %v537_v10 = vrot.slane %v533_v63, 7  ;;  %v687_v12 = vmul.f32 %v685_v27, %v1846_v43  ;;  %v692_v17 = vmul.f32 %v690_v59, %v1846_v43  ;;  %v1926_v13 = vpop.permute.xlu1 %810 }
 0x15a   : > { %v549_v14 = vadd.f32 %v547_v0, %v521_v61  ;;  %v562_v15 = vrot.slane %v558_v4, 7  ;;  %v563_v19 = vrot.slane %v559_v5, 7  ;;  %v697_v20 = vperm.slane %v1891_v9, 7 }
 0x15b   : > { %v538_v22 = vsel %vm464_vm11, %v536_v8, %v537_v10  ;;  %v527_v23 = vmul.f32 %v524_v26, %v1751_v47  ;;  %v553_v28 = vmul.f32 %v550_v18, %v1705_v21  ;;  %v693_v32 = vmul.f32 %v690_v59, %v1867_v2  ;;  %v1933_v33 = vpop.permute.xlu2 %826  ;;  %v1935_v34 = vpop.permute.xlu0 %806 }
 0x15c   : > { %v543_v35 = vadd.f32 %v538_v22, %v526_v30  ;;  %v564_v36 = vsel %vm464_vm11, %v562_v15, %v563_v19  ;;  %v1938_v37 = vadd.f32 %v687_v12, %v549_v14  ;;  %v699_v38 = vmul.f32 %v697_v20, %v1846_v43 }
 0x15d   : > { %v544_v25 = vadd.f32 %v537_v10, %v527_v23  ;;  %v520_v39 = vmul.f32 %v519_v29, %v1717_v31  ;;  %v525_v47 = vmul.f32 %v524_v26, %v1717_v31  ;;  %v546_v40 = vmul.f32 %v545_v54, %v1669_v3 }
 0x15e   : > { %v555_v7 = vadd.f32 %v552_v1, %v543_v35  ;;  %v703_v2 = vrot.slane %v699_v38, 7  ;;  %v551_v46 = vmul.f32 %v550_v18, %v1669_v3  ;;  %v1946_v48 = vperm.slane %v1891_v9, 3 }
 0x15f   : > { %v556_v53 = vadd.f32 %v553_v28, %v544_v25  ;;  %v542_v55 = vadd.f32 %v536_v8, %v525_v47  ;;  %v548_v61 = vadd.f32 %v546_v40, %v520_v39  ;;  %v686_v30 = vmul.f32 %v685_v27, %v1871_v11 }
 0x160   : > { %v569_v43 = vadd.f32 %v564_v36, %v555_v7  ;;  %v717_v29 = vmul.f32 %v1946_v48, %v1754_v24  ;;  %v691_v31 = vmul.f32 %v690_v59, %v1871_v11  ;;  %v698_v26 = vmul.f32 %v697_v20, %v1871_v11 }
 0x161   : > { %v570_v54 = vadd.f32 %v563_v19, %v556_v53  ;;  %v554_v62 = vadd.f32 %v551_v46, %v542_v55  ;;  %v1953_v63 = vadd.f32 %v686_v30, %v548_v61  ;;  %v1956_v18 = vperm.slane %v1888_v44, 1  ;;  %v820_v0 = vpop.permute.xlu1 %819 }
 0x162   : > { %v695_v1 = vadd.f32 %v692_v17, %v569_v43  ;;  %v702_v4 = vrot.slane %v698_v26, 7  ;;  %v459_v27 = vperm.slane %v1888_v44, 7  ;;  %v1960_v5 = vperm.slane %v1891_v9, 2 }
 0x163   : > { %v696_v8 = vadd.f32 %v693_v32, %v570_v54  ;;  %v568_v10 = vadd.f32 %v562_v15, %v554_v62  ;;  %v455_v11 = vmul.f32 %v1956_v18, %v1705_v21  ;;  %v626_v59 = vperm.slane %v1897_v49, 0  ;;  %v836_v12 = vpop.permute.xlu2 %835  ;;  %v816_v14 = vpop.permute.xlu0 %815 }
 0x164   : > { %v704_v19 = vsel %vm464_vm11, %v702_v4, %v703_v2  ;;  %v1967_v20 = vmul.f32 %v459_v27, %v1669_v3  ;;  %v461_v17 = vmul.f32 %v459_v27, %v1657_v60  ;;  %v622_v22 = vmul.f32 %v1960_v5, %v1784_v58 }
 0x165   : > { %v710_v23 = vadd.f32 %v703_v2, %v696_v8  ;;  %v694_v28 = vadd.f32 %v691_v31, %v568_v10  ;;  %v709_v15 = vadd.f32 %v704_v19, %v695_v1  ;;  %v1973_v32 = vmul.f32 %v626_v59, %v1754_v24 }
 0x166   : > { %v465_v21 = vrot.slane %v1967_v20, 7  ;;  %v466_v35 = vrot.slane %v461_v17, 7  ;;  %v628_v36 = vmul.f32 %v626_v59, %v1739_v41  ;;  %v785_v38 = vperm.slane %v1897_v49, 3 }
 0x167   : > { %v708_v25 = vadd.f32 %v702_v4, %v694_v28  ;;  %v631_v39 = vrot.slane %v1973_v32, 7  ;;  %v882_v47 = vperm.slane %v1897_v49, 4  ;;  %v792_v40 = vperm.slane %v1894_v45, 1 }
 0x168   : > { %v1984_v7 = vsel %vm464_vm11, %v465_v21, %v466_v35  ;;  %v473_v2 = vadd.f32 %v466_v35, %v455_v11  ;;  %v632_v46 = vrot.slane %v628_v36, 7  ;;  %v1987_v53 = vmul.f32 %v785_v38, %v1876_v16 }
 0x169   : > { %v720_v55 = vadd.f32 %v717_v29, %v708_v25  ;;  %v788_v61 = vmul.f32 %v785_v38, %v1885_v42  ;;  %v1991_v30 = vmul.f32 %v882_v47, %v1876_v16  ;;  %v1994_v43 = vmul.f32 %v882_v47, %v1885_v42  ;;  %v829_v31 = vpop.permute.xlu1 %828 }
 0x16a   : > { %v625_v26 = vadd.f32 %v622_v22, %v473_v2  ;;  %v1999_v54 = vsel %vm464_vm11, %v631_v39, %v632_v46  ;;  %v2002_v62 = vmul.f32 %v785_v38, %v1903_v52  ;;  %v2007_v29 = vmul.f32 %v792_v40, %v1903_v52 }
 0x16b   : > { %v846_v42 = vsel %vm258_vm3, %v1900_v50, %v1933_v33  ;;  %v711_v1 = vperm.slane %v1891_v9, 6  ;;  %v718_v4 = vmul.f32 %v1946_v48, %v1739_v41  ;;  %v2015_v27 = vpop.permute.xlu2 %974  ;;  %v825_v8 = vpop.permute.xlu0 %824  ;;  %v844_v11 = vsel %vm395_vm1, %v1926_v13, %v820_v0 }
 0x16c   : > { %v639_v10 = vadd.f32 %v632_v46, %v625_v26  ;;  %v723_v59 = vperm.slane %v1897_v49, 1  ;;  %v849_v19 = vsel %vm443_vm5, %v846_v42, %v836_v12  ;;  %v851_v50 = vperm.slane %v1897_v49, 5 }
 0x16d   : > { %v713_v17 = vmul.f32 %v711_v1, %v1739_v41  ;;  %v721_v22 = vadd.f32 %v718_v4, %v709_v15  ;;  %v856_v33 = vperm.slane %v1897_v49, 2  ;;  %v863_v38 = vperm.slane %v1894_v45, 0 }
 0x16e   : > { %v791_v28 = vadd.f32 %v788_v61, %v639_v10  ;;  %v724_v35 = vmul.f32 %v723_v59, %v1754_v24  ;;  %v725_v36 = vmul.f32 %v723_v59, %v1739_v41  ;;  %v853_v0 = vmul.f32 %v851_v50, %v849_v19 }
 0x16f   : > { %v715_v13 = vadd.f32 %v713_v17, %v1938_v37  ;;  %v858_v25 = vmul.f32 %v856_v33, %v849_v19  ;;  %v865_v46 = vmul.f32 %v863_v38, %v849_v19  ;;  %v847_v15 = vsel %vm258_vm3, %v844_v11, %v829_v31 }
 0x170   : > { %v728_v2 = vrot.slane %v724_v35, 7  ;;  %v729_v12 = vrot.slane %v725_v36, 7  ;;  %v842_v42 = vsel %vm395_vm1, %v1935_v34, %v816_v14  ;;  %v719_v4 = vmul.f32 %v1946_v48, %v1784_v58 }
 0x171   : > { %v855_v26 = vadd.f32 %v853_v0, %v715_v13  ;;  %v838_v61 = vpop.permute.xlu1 %837  ;;  %v712_v10 = vmul.f32 %v711_v1, %v1754_v24  ;;  %v845_v37 = vsel %vm258_vm3, %v842_v42, %v825_v8  ;;  %v883_v13 = vmul.f32 %v882_v47, %v1903_v52 }
 0x172   : > { %v730_v59 = vsel %vm464_vm11, %v728_v2, %v729_v12  ;;  %v850_v17 = vsel %vm443_vm5, %v847_v15, %v838_v61  ;;  %v734_v35 = vadd.f32 %v728_v2, %v720_v55  ;;  %v722_v36 = vadd.f32 %v719_v4, %v710_v23 }
 0x173   : > { %v735_v19 = vadd.f32 %v730_v59, %v721_v22  ;;  %v859_v31 = vmul.f32 %v856_v33, %v850_v17  ;;  %v2037_v11 = vpop.permute.xlu2 %976  ;;  %v714_v34 = vadd.f32 %v712_v10, %v1953_v63  ;;  %v834_v14 = vpop.permute.xlu0 %833  ;;  %v889_v48 = vperm.slane %v1894_v45, 2 }
 0x174   : > { %v848_v58 = vsel %vm443_vm5, %v845_v37, %v834_v14  ;;  %v736_v0 = vadd.f32 %v729_v12, %v722_v36  ;;  %v869_v22 = vrot.slane %v865_v46, 7  ;;  %v877_v47 = vperm.slane %v1897_v49, 7 }
 0x175   : > { %v861_v1 = vadd.f32 %v858_v25, %v735_v19  ;;  %v852_v8 = vmul.f32 %v851_v50, %v848_v58  ;;  %v857_v42 = vmul.f32 %v856_v33, %v848_v58  ;;  %v864_v15 = vmul.f32 %v863_v38, %v848_v58 }
 0x176   : > { %v891_v55 = vmul.f32 %v889_v48, %v1876_v16  ;;  %v890_v23 = vmul.f32 %v889_v48, %v1903_v52  ;;  %v862_v2 = vadd.f32 %v859_v31, %v736_v0  ;;  %v794_v50 = vmul.f32 %v792_v40, %v1876_v16 }
 0x177   : > { %v854_v61 = vadd.f32 %v852_v8, %v714_v34  ;;  %v860_v63 = vadd.f32 %v857_v42, %v734_v35  ;;  %v868_v4 = vrot.slane %v864_v15, 7  ;;  %v879_v12 = vmul.f32 %v877_v47, %v1876_v16 }
 0x178   : > { %v876_v10 = vadd.f32 %v869_v22, %v862_v2  ;;  %v895_v37 = vrot.slane %v891_v55, 7  ;;  %v894_v25 = vrot.slane %v890_v23, 7  ;;  %v798_v36 = vrot.slane %v794_v50, 7 }
 0x179   : > { %v2046_v59 = vpop.permute.xlu1 %981  ;;  %v870_v33 = vsel %vm464_vm11, %v868_v4, %v869_v22  ;;  %v874_v38 = vadd.f32 %v868_v4, %v860_v63  ;;  %v878_v31 = vmul.f32 %v877_v47, %v1903_v52  ;;  %v881_v14 = vadd.f32 %v879_v12, %v855_v26 }
 0x17a   : > { %v875_v46 = vadd.f32 %v870_v33, %v861_v1  ;;  %v888_v19 = vadd.f32 %v1994_v43, %v876_v10  ;;  %v2060_v40 = vadd.f32 %v798_v36, %v791_v28  ;;  %v896_v0 = vsel %vm464_vm11, %v894_v25, %v895_v37 }
 0x17b   : > { %v993_v17 = vpop.permute.xlu2 %992  ;;  %v2053_v35 = vpop.permute.xlu0 %972  ;;  %v886_v34 = vadd.f32 %v883_v13, %v874_v38  ;;  %v2065_v1 = vadd.f32 %v878_v31, %v854_v61  ;;  %v447_v42 = vperm.slane %v1888_v44, 4  ;;  %v614_v43 = vperm.slane %v1891_v9, 5 }
 0x17c   : > { %v887_v58 = vadd.f32 %v1991_v30, %v875_v46  ;;  %v2058_v48 = vadd.f32 %v895_v37, %v888_v19  ;;  %v797_v15 = vrot.slane %v2007_v29, 7  ;;  %v780_v26 = vperm.slane %v1897_v49, 6 }
 0x17d   : > { %v2063_v8 = vadd.f32 %v894_v25, %v886_v34  ;;  %v453_v30 = vmul.f32 %v1956_v18, %v1669_v3  ;;  %v449_v28 = vmul.f32 %v447_v42, %v1657_v60  ;;  %v616_v13 = vmul.f32 %v614_v43, %v1739_v41 }
 0x17e   : > { %v448_v55 = vmul.f32 %v447_v42, %v1669_v3  ;;  %v615_v23 = vmul.f32 %v614_v43, %v1754_v24  ;;  %v782_v44 = vmul.f32 %v780_v26, %v1876_v16  ;;  %v781_v9 = vmul.f32 %v780_v26, %v1903_v52 }
 0x17f   : > { %v471_v29 = vadd.f32 %v465_v21, %v453_v30  ;;  %v620_v49 = vmul.f32 %v1960_v5, %v1754_v24  ;;  %v618_v2 = vadd.f32 %v616_v13, %v449_v28  ;;  %v454_v63 = vmul.f32 %v1956_v18, %v1657_v60 }
 0x180   : > { %v617_v61 = vadd.f32 %v615_v23, %v448_v55  ;;  %v621_v10 = vmul.f32 %v1960_v5, %v1739_v41  ;;  %v799_v16 = vsel %vm464_vm11, %v797_v15, %v798_v36  ;;  %v1017_v60 = vperm.slane %v1894_v45, 6 }
 0x181   : > { %v986_v22 = vpop.permute.xlu1 %985  ;;  %v623_v47 = vadd.f32 %v620_v49, %v471_v29  ;;  %v784_v20 = vadd.f32 %v782_v44, %v618_v2  ;;  %v472_v24 = vadd.f32 %v1984_v7, %v454_v63  ;;  %v901_v18 = vadd.f32 %v896_v0, %v887_v58 }
 0x182   : > { %v2090_v21 = vadd.f32 %v781_v9, %v617_v61  ;;  %v1022_v7 = vperm.slane %v1894_v45, 3  ;;  %v1010_v31 = vsel %vm395_vm1, %v2037_v11, %v986_v22  ;;  %v1029_v34 = vperm.slane %v1906_v6, 1 }
 0x183   : > { %v1002_v4 = vpop.permute.xlu2 %1001  ;;  %v984_v3 = vpop.permute.xlu0 %983  ;;  %v637_v25 = vadd.f32 %v631_v39, %v623_v47  ;;  %v624_v5 = vadd.f32 %v621_v10, %v472_v24  ;;  %v1008_v0 = vsel %vm395_vm1, %v2053_v35, %v2046_v59  ;;  %v1048_v47 = vperm.slane %v1894_v45, 5 }
 0x184   : > { %v1009_v52 = vsel %vm395_vm1, %v2015_v27, %v984_v3  ;;  %v1043_v3 = vperm.slane %v1906_v6, 0 }
 0x185   : > { %v1012_v37 = vsel %vm258_vm3, %v1009_v52, %v993_v17  ;;  %v789_v33 = vadd.f32 %v2002_v62, %v637_v25  ;;  %v638_v27 = vadd.f32 %v1999_v54, %v624_v5  ;;  %v1055_v5 = vperm.slane %v1906_v6, 3 }
 0x186   : > { %v1015_v41 = vsel %vm443_vm5, %v1012_v37, %v1002_v4 }
 0x187   : > { %v1019_v50 = vmul.f32 %v1017_v60, %v1015_v41  ;;  %v2100_v46 = vadd.f32 %v797_v15, %v789_v33  ;;  %v790_v17 = vadd.f32 %v1987_v53, %v638_v27  ;;  %v1024_v32 = vmul.f32 %v1022_v7, %v1015_v41 }
 0x188   : > { %v1031_v62 = vmul.f32 %v1029_v34, %v1015_v41  ;;  %v958_v41 = vperm.slane %v1906_v6, 2  ;;  %v951_v33 = vperm.slane %v1894_v45, 4 }
 0x189   : > { %v995_v38 = vpop.permute.xlu1 %994  ;;  %v1021_v12 = vadd.f32 %v1019_v50, %v881_v14  ;;  %v804_v39 = vadd.f32 %v799_v16, %v790_v17  ;;  %v1027_v58 = vadd.f32 %v1024_v32, %v901_v18 }
 0x18a   : > { %v1013_v54 = vsel %vm258_vm3, %v1010_v31, %v995_v38  ;;  %v1035_v30 = vrot.slane %v1031_v62, 7 }
 0x18b   : > { %v913_v19 = vpop.permute.xlu2 %912  ;;  %v991_v36 = vpop.permute.xlu0 %990 }
 0x18c   : > { %v1011_v42 = vsel %vm258_vm3, %v1008_v0, %v991_v36  ;;  %v938_v22 = vsel %vm395_vm1, %v1775_v57, %v913_v19  ;;  %v946_v57 = vperm.slane %v1894_v45, 7 }
 0x191   : > { %v1004_v14 = vpop.permute.xlu1 %1003 }
 0x192   : > { %v1016_v53 = vsel %vm443_vm5, %v1013_v54, %v1004_v14 }
 0x193   : > { %v1025_v43 = vmul.f32 %v1022_v7, %v1016_v53  ;;  %v922_v15 = vpop.permute.xlu2 %921  ;;  %v1000_v26 = vpop.permute.xlu0 %999 }
 0x194   : > { %v1014_v11 = vsel %vm443_vm5, %v1011_v42, %v1000_v26  ;;  %v941_v29 = vsel %vm258_vm3, %v938_v22, %v922_v15 }
 0x195   : > { %v1028_v28 = vadd.f32 %v1025_v43, %v2058_v48  ;;  %v1018_v13 = vmul.f32 %v1017_v60, %v1014_v11  ;;  %v1023_v55 = vmul.f32 %v1022_v7, %v1014_v11  ;;  %v1030_v23 = vmul.f32 %v1029_v34, %v1014_v11 }
 0x197   : > { %v1026_v59 = vadd.f32 %v1023_v55, %v2063_v8  ;;  %v1034_v35 = vrot.slane %v1030_v23, 7  ;;  %v1042_v44 = vadd.f32 %v1035_v30, %v1028_v28  ;;  %v1020_v9 = vadd.f32 %v1018_v13, %v2065_v1 }
 0x199   : > { %v1040_v49 = vadd.f32 %v1034_v35, %v1026_v59  ;;  %v915_v2 = vpop.permute.xlu1 %914  ;;  %v1036_v61 = vsel %vm464_vm11, %v1034_v35, %v1035_v30 }
 0x19a   : > { %v1041_v63 = vadd.f32 %v1036_v61, %v1027_v58  ;;  %v939_v25 = vsel %vm395_vm1, %v1773_v56, %v915_v2 }
 0x19b   : > { %v931_v48 = vpop.permute.xlu2 %930  ;;  %v911_v4 = vpop.permute.xlu0 %910 }
 0x19c   : > { %v944_v8 = vsel %vm443_vm5, %v941_v29, %v931_v48  ;;  %v937_v7 = vsel %vm395_vm1, %v1762_v51, %v911_v4 }
 0x19d   : > { %v1045_v10 = vmul.f32 %v1043_v3, %v944_v8  ;;  %v1050_v16 = vmul.f32 %v1048_v47, %v944_v8  ;;  %v948_v1 = vmul.f32 %v946_v57, %v944_v8  ;;  %v960_v27 = vmul.f32 %v958_v41, %v944_v8 }
 0x19e   : > { %v1057_v38 = vmul.f32 %v1055_v5, %v944_v8 }
 0x19f   : > { %v1047_v52 = vadd.f32 %v1045_v10, %v1021_v12  ;;  %v1053_v24 = vadd.f32 %v1050_v16, %v1041_v63  ;;  %v950_v37 = vadd.f32 %v948_v1, %v784_v20  ;;  %v953_v20 = vmul.f32 %v951_v33, %v944_v8 }
 0x1a0   : > { %v1061_v34 = vrot.slane %v1057_v38, 7  ;;  %v964_v11 = vrot.slane %v960_v27, 7 }
 0x1a1   : > { %1073 = vrot.lane.b32.xlu2 %v1047_v52, %s1384_s23  ;;  %v924_v60 = vpop.permute.xlu1 %923  ;;  %v956_v31 = vadd.f32 %v953_v20, %v804_v39 }
 0x1a2   : > { %v942_v50 = vsel %vm258_vm3, %v939_v25, %v924_v60 }
 0x1a3   : > { %v920_v18 = vpop.permute.xlu0 %919 }
 0x1a4   : > { %v940_v19 = vsel %vm258_vm3, %v937_v7, %v920_v18 }
 0x1a9   : > { %v933_v12 = vpop.permute.xlu1 %932 }
 0x1aa   : > { %v945_v17 = vsel %vm443_vm5, %v942_v50, %v933_v12 }
 0x1ab   : > { %v954_v56 = vmul.f32 %v951_v33, %v945_v17  ;;  %v1051_v36 = vmul.f32 %v1048_v47, %v945_v17  ;;  %v929_v32 = vpop.permute.xlu0 %928 }
 0x1ac   : > { %v943_v6 = vsel %vm443_vm5, %v940_v19, %v929_v32 }
 0x1ad   : > { %v957_v45 = vadd.f32 %v954_v56, %v2060_v40  ;;  %v1054_v62 = vadd.f32 %v1051_v36, %v1042_v44  ;;  %v1044_v58 = vmul.f32 %v1043_v3, %v943_v6  ;;  %v1049_v54 = vmul.f32 %v1048_v47, %v943_v6 }
 0x1ae   : > { %v1056_v14 = vmul.f32 %v1055_v5, %v943_v6  ;;  %v947_v40 = vmul.f32 %v946_v57, %v943_v6  ;;  %v952_v26 = vmul.f32 %v951_v33, %v943_v6  ;;  %v959_v30 = vmul.f32 %v958_v41, %v943_v6 }
 0x1af   : > { %v1046_v0 = vadd.f32 %v1044_v58, %v1020_v9  ;;  %v1068_v53 = vadd.f32 %v1061_v34, %v1054_v62  ;;  %v1052_v51 = vadd.f32 %v1049_v54, %v1040_v49  ;;  %v971_v23 = vadd.f32 %v964_v11, %v957_v45 }
 0x1b0   : > { %v1060_v42 = vrot.slane %v1056_v14, 7  ;;  %v949_v28 = vadd.f32 %v947_v40, %v2090_v21  ;;  %v955_v13 = vadd.f32 %v952_v26, %v2100_v46  ;;  %v963_v55 = vrot.slane %v959_v30, 7 }
 0x1b1   : > { %1071 = vrot.lane.b32.xlu0 %v1046_v0, %s1384_s23  ;;  %1088 = vrot.lane.b32.xlu2 %v1068_v53, %s1384_s23 }
 0x1b2   : > { %v1066_v43 = vadd.f32 %v1060_v42, %v1052_v51  ;;  %v1062_v39 = vsel %vm464_vm11, %v1060_v42, %v1061_v34  ;;  %v969_v22 = vadd.f32 %v963_v55, %v955_v13  ;;  %v965_v59 = vsel %vm464_vm11, %v963_v55, %v964_v11 }
 0x1b3   : > { %v1067_v15 = vadd.f32 %v1062_v39, %v1053_v24  ;;  %v970_v35 = vadd.f32 %v965_v59, %v956_v31 }
 0x1b4   : > { %1084 = vrot.lane.b32.xlu1 %v1066_v43, %s1384_s23 }
 0x1b9   : > { %1086 = vrot.lane.b32.xlu0 %v1067_v15, %s1384_s23 }
 0x1fb   : > { %v1074_v44 = vpop.permute.xlu2 %1073 }
 0x1fc   : > { %v1078_v9 = vsel %vm340_vm6, %v950_v37, %v1074_v44 }
 0x1fd   : > { %1080 = vst [vmem:[%s244_s15 + $0x8] sm:$0xff] %v1078_v9 }
 0x20b   : > { %v1089_v29 = vpop.permute.xlu2 %1088 }
 0x20c   : > { %v1095_v49 = vsel %vm340_vm6, %v971_v23, %v1089_v29 }
 0x20d   : > { %1201 = vst [vmem:[%s244_s15 + $0x1f] sm:$0x1] %v1095_v49 }
 0x223   : > { %v1072_v21 = vpop.permute.xlu0 %1071 }
 0x224   : > { %v1077_v46 = vsel %vm340_vm6, %v949_v28, %v1072_v21 }
 0x225   : > { %1079 = vst [vmem:[%s244_s15] sm:$0xff] %v1077_v46 }
 0x226   : > { %v1085_v2 = vpop.permute.xlu1 %1084 }
 0x227   : > { %v1093_v61 = vsel %vm340_vm6, %v969_v22, %v1085_v2 }
 0x228   : > { %1199 = vst [vmem:[%s244_s15 + $0xf] sm:$0xfe] %v1093_v61 }
 0x22b   : > { %v1087_v63 = vpop.permute.xlu0 %1086 }
 0x22c   : > { %v1094_v48 = vsel %vm340_vm6, %v970_v35, %v1087_v63 }
 0x22d   : > { %1200 = vst [vmem:[%s244_s15 + $0x17] sm:$0xff] %v1094_v48 }
 0x22e   : > { %1332 = shalt.err (!%p1329_p4)
}
 0x22f   : > { %s1385_s12 = smov 128   ;;  %s1386_s13 = smov 8  }
 0x230   : > { %1211 = dma.vmem_to_hbm [thread:$0]  (%p1467_p11), %s1114_s29, 512, %s1116_s7, %s1101_s22, %s1385_s12, %s1385_s12, %s1386_s13  }
 0x231 PF: > { %s1130_s15 = sand.u32 1, %s1359_s18   ;;  %p2196_p7 = scmp.ge.s32.totalorder %s1371_s21, 2 }
 0x232   : > { %s1131_s17 = scalar_lea.sflag [#allocation5], %s1130_s15 }
 0x233   : > { %p1218_p5 = pnand %p2196_p7, %p1471_p12 }
 0x235   : > { %p1219_p8 = pneg %p1218_p5 }
 0x237   : > { %1354 = dma.done.wait (%p1219_p8), %s1131_s17, 512  }
 0x238   : > { %1356 = vsyncadd (%p1219_p8), %s1131_s17, 4294966784  ;;  %p18_p10 = scmp.ge.s32.totalorder %s1442_s24, 4   ;;  %s2197_s18 = smov %s1363_s19 }
 0x239   : > { %s2198_s19 = smov %s1367_s20  ;;  %s2199_s20 = smov %s1454_s27 }
 0x23a   : > { %s2200_s21 = smov %s1442_s24  ;;  %20 = sbr.rel (!%p18_p10) target bundleno = 5 (0x5), region = 90 }
 0x23f   :  { %1137 = vsyncpa [#allocation4], 1 }
 0x240   :  { %1139 = vsyncpa [#allocation4 + $0x1], 1 }
 0x241   :  { %1140 = vsyncpa [#allocation5], 1 }
 0x242   :  { %1142 = vsyncpa [#allocation5 + $0x1], 1 }

</bundles_post_ra>
